<compile_context>
chip_gen: v6e
topology: v6e:2x2x1
jax: 0.10.0
libtpu: 0.0.40
codegen_flags: <defaults>
</compile_context>

<pallas_src>
import jax
import jax.numpy as jnp
from jax import lax
from jax.experimental import pallas as pl
from jax.experimental.pallas import tpu as pltpu

# Padded sizes (MXU / lane friendly).
K1_PAD, OC1_PAD = 128, 8      # conv1: K = 25*1  -> 128, OC 6  -> 8
K2_PAD, OC2_PAD = 256, 16     # conv2: K = 25*6  -> 256, OC 16 -> 16
H1_PAD, H2_PAD = 128, 128     # fc hidden 120 -> 128, 84 -> 128


# ------------------------------ Pallas kernels ------------------------------ #

def _conv_pool_kernel(p_ref, w_ref, b_ref, o_ref):
    """Fused 5x5 'same' conv + bias + ReLU + 2x2 max-pool.

    p_ref: (4, K, M) im2col patches, one (K, M) slab per pool-window offset.
    w_ref: (OCp, K) taps-folded weights.  b_ref: (OCp, 1).  o_ref: (OCp, M).
    """
    w = w_ref[...]
    m = jnp.dot(w, p_ref[0], preferred_element_type=jnp.float32)
    for p in range(1, 4):   # static unroll: 4 pool-window offsets, same weights
        m = jnp.maximum(m, jnp.dot(w, p_ref[p], preferred_element_type=jnp.float32))
    # max_p ReLU(conv_p + b) == ReLU(max_p conv_p + b)  (b is per-channel const)
    o_ref[...] = jnp.maximum(m + b_ref[...], 0.0)


def _mlp_kernel(x_ref, w1_ref, b1_ref, w2_ref, b2_ref, w3_ref, b3_ref, o_ref):
    """Fused fc1+ReLU -> fc2+ReLU -> fc3 (hidden dims zero-padded to 128)."""
    h = jnp.dot(x_ref[...], w1_ref[...], preferred_element_type=jnp.float32)
    h = jnp.maximum(h + b1_ref[...], 0.0)
    h = jnp.dot(h, w2_ref[...], preferred_element_type=jnp.float32)
    h = jnp.maximum(h + b2_ref[...], 0.0)
    o_ref[...] = jnp.dot(h, w3_ref[...], preferred_element_type=jnp.float32) + b3_ref[...]


# ------------------------------ call wrappers ------------------------------- #

def _full_spec(shape):
    nd = len(shape)
    return pl.BlockSpec(shape, lambda i, _nd=nd: (0,) * _nd)


def conv_pool_stage(patches, w_t, b):
    """patches: (4, K, M); w_t: (OCp, K); b: (OCp, 1)  ->  (OCp, M)."""
    _, K, M = patches.shape
    OCp = w_t.shape[0]
    return pl.pallas_call(
        _conv_pool_kernel,
        out_shape=jax.ShapeDtypeStruct((OCp, M), jnp.float32),
        grid=(1,),
        in_specs=[_full_spec(patches.shape), _full_spec(w_t.shape), _full_spec(b.shape)],
        out_specs=_full_spec((OCp, M)),
        compiler_params=pltpu.CompilerParams(dimension_semantics=("arbitrary",)),
    )(patches, w_t, b)


def mlp_stage(x, w1, b1, w2, b2, w3, b3):
    args = (x, w1, b1, w2, b2, w3, b3)
    out_shape = (x.shape[0], w3.shape[1])
    return pl.pallas_call(
        _mlp_kernel,
        out_shape=jax.ShapeDtypeStruct(out_shape, jnp.float32),
        grid=(1,),
        in_specs=[_full_spec(a.shape) for a in args],
        out_specs=_full_spec(out_shape),
        compiler_params=pltpu.CompilerParams(dimension_semantics=("arbitrary",)),
    )(*args)


# ------------------------- XLA-side data-movement glue ----------------------- #

def pooled_im2col(x_nhwc, k_pad):
    """im2col for a 5x5 'same' conv evaluated only at the 4 offsets of each
    2x2 max-pool window.  Returns (4, k_pad, N*(H//2)*(W//2)); contraction index
    ordered (dy, dx, ic), zero-padded to k_pad.  Pure data movement feeding the
    single-matmul Pallas kernel."""
    N, H, W, IC = x_nhwc.shape
    Ho, Wo = H // 2, W // 2
    M = N * Ho * Wo
    xp = jnp.pad(x_nhwc, ((0, 0), (2, 2), (2, 2), (0, 0)))
    groups = []
    for py in range(2):
        for px in range(2):
            taps = []
            for dy in range(5):
                for dx in range(5):
                    r0, c0 = py + dy, px + dx
                    taps.append(xp[:, r0:r0 + 2 * Ho - 1:2, c0:c0 + 2 * Wo - 1:2, :])
            p = jnp.concatenate(taps, axis=-1).reshape(M, 25 * IC)   # (M, 25*IC)
            p = jnp.pad(p, ((0, 0), (0, k_pad - 25 * IC)))
            groups.append(p.T)                                        # (k_pad, M)
    return jnp.stack(groups, axis=0)                                  # (4, k_pad, M)


def fold_conv_params(w_oihw, bias, k_pad, oc_pad):
    """Torch conv weight (OC, IC, 5, 5) -> (oc_pad, k_pad) with k = (dy, dx, ic)."""
    OC, IC, KH, KW = w_oihw.shape
    w = jnp.transpose(w_oihw, (0, 2, 3, 1)).reshape(OC, KH * KW * IC)
    w = jnp.pad(w, ((0, oc_pad - OC), (0, k_pad - KH * KW * IC)))
    b = jnp.pad(bias, (0, oc_pad - OC)).reshape(oc_pad, 1)
    return w, b


def fold_fc_params(w_torch, bias, in_pad, out_pad):
    """Torch Linear (out, in), y = x @ W.T + b  ->  (in_pad, out_pad), (1, out_pad)."""
    out_f, in_f = w_torch.shape
    w = jnp.pad(w_torch.T, ((0, in_pad - in_f), (0, out_pad - out_f)))
    b = jnp.pad(bias, (0, out_pad - out_f)).reshape(1, out_pad)
    return w, b


# --------------------------------- forward ---------------------------------- #

@jax.jit
def lenet_forward(x_nchw, params):
    (w1c, b1c, w2c, b2c, w1f, b1f, w2f, b2f, w3f, b3f) = params
    x = jnp.transpose(x_nchw.astype(jnp.float32), (0, 2, 3, 1))      # NCHW -> NHWC
    N = x.shape[0]

    # stage 1: conv1 + bias + ReLU + 2x2 max-pool, fused
    p1 = pooled_im2col(x, K1_PAD)                                    # (4, 128, N*14*14)
    a1 = conv_pool_stage(p1, w1c, b1c)                               # (8, N*14*14)
    a1 = a1[:6].reshape(6, N, 14, 14).transpose(1, 2, 3, 0)          # (N, 14, 14, 6)

    # stage 2: conv2 + bias + ReLU + 2x2 max-pool, fused
    p2 = pooled_im2col(a1, K2_PAD)                                   # (4, 256, N*7*7)
    a2 = conv_pool_stage(p2, w2c, b2c)                               # (16, N*7*7)

    # torch-order flatten: out.view(N, 16*7*7) of an NCHW tensor
    feat = a2.reshape(16, N, 7, 7).transpose(1, 0, 2, 3).reshape(N, 16 * 7 * 7)

    # stage 3: fc1 + ReLU + fc2 + ReLU + fc3, fused
    return mlp_stage(feat, w1f, b1f, w2f, b2f, w3f, b3f)             # (N, 10)


def reference_forward(x, raw):
    """Pure-JAX reference matching the PyTorch module (HIGHEST precision)."""
    (wc1, bc1, wc2, bc2, wf1, bf1, wf2, bf2, wf3, bf3) = raw
    dn = ("NCHW", "OIHW", "NCHW")
    hp = lax.Precision.HIGHEST
    o = lax.conv_general_dilated(x, wc1, (1, 1), ((2, 2), (2, 2)),
                                 dimension_numbers=dn, precision=hp)
    o = jnp.maximum(o + bc1[None, :, None, None], 0.0)
    o = lax.reduce_window(o, -jnp.inf, lax.max, (1, 1, 2, 2), (1, 1, 2, 2), "VALID")
    o = lax.conv_general_dilated(o, wc2, (1, 1), ((2, 2), (2, 2)),
                                 dimension_numbers=dn, precision=hp)
    o = jnp.maximum(o + bc2[None, :, None, None], 0.0)
    o = lax.reduce_window(o, -jnp.inf, lax.max, (1, 1, 2, 2), (1, 1, 2, 2), "VALID")
    o = o.reshape(o.shape[0], -1)
    o = jnp.maximum(jnp.dot(o, wf1.T, precision=hp) + bf1, 0.0)
    o = jnp.maximum(jnp.dot(o, wf2.T, precision=hp) + bf2, 0.0)
    return jnp.dot(o, wf3.T, precision=hp) + bf3


if __name__ == "__main__":
    key = jax.random.PRNGKey(0)
    ks = jax.random.split(key, 11)

    # Deterministic synthetic parameters, torch layouts/shapes from __init__.
    wc1 = 0.2 * jax.random.normal(ks[0], (6, 1, 5, 5), jnp.float32)
    bc1 = 0.1 * jax.random.normal(ks[1], (6,), jnp.float32)
    wc2 = 0.1 * jax.random.normal(ks[2], (16, 6, 5, 5), jnp.float32)
    bc2 = 0.1 * jax.random.normal(ks[3], (16,), jnp.float32)
    wf1 = 0.05 * jax.random.normal(ks[4], (120, 16 * 7 * 7), jnp.float32)
    bf1 = 0.05 * jax.random.normal(ks[5], (120,), jnp.float32)
    wf2 = 0.05 * jax.random.normal(ks[6], (84, 120), jnp.float32)
    bf2 = 0.05 * jax.random.normal(ks[7], (84,), jnp.float32)
    wf3 = 0.05 * jax.random.normal(ks[8], (10, 84), jnp.float32)
    bf3 = 0.05 * jax.random.normal(ks[9], (10,), jnp.float32)
    raw = (wc1, bc1, wc2, bc2, wf1, bf1, wf2, bf2, wf3, bf3)

    # Fold / pad parameters for the Pallas kernels (setup-time glue).
    w1c, b1c = fold_conv_params(wc1, bc1, K1_PAD, OC1_PAD)           # (8, 128),  (8, 1)
    w2c, b2c = fold_conv_params(wc2, bc2, K2_PAD, OC2_PAD)           # (16, 256), (16, 1)
    w1f, b1f = fold_fc_params(wf1, bf1, 16 * 7 * 7, H1_PAD)          # (784, 128), (1, 128)
    w2f, b2f = fold_fc_params(wf2, bf2, H1_PAD, H2_PAD)              # (128, 128), (1, 128)
    w3f, b3f = fold_fc_params(wf3, bf3, H2_PAD, 10)                  # (128, 10),  (1, 10)
    params = (w1c, b1c, w2c, b2c, w1f, b1f, w2f, b2f, w3f, b3f)

    # Input implied by fc1 = Linear(16*7*7, 120): 28x28, 1 channel, NCHW like torch.
    x = jax.random.normal(ks[10], (2, 1, 28, 28), jnp.float32)

    out = jax.block_until_ready(lenet_forward(x, params))
    assert out.shape == (2, 10) and bool(jnp.all(jnp.isfinite(out)))

    ref = reference_forward(x, raw)
    err = float(jnp.max(jnp.abs(out - ref)))
    assert jnp.allclose(out, ref, rtol=2e-2, atol=2e-2), f"max abs err = {err}"

    print("KERNEL_OK")
</pallas_src>

<mosaic_0001>
module attributes {stable_mosaic.version = 11 : i64} {
  func.func @_conv_pool_kernel(%arg0: i32, %arg1: memref<4x128x392xf32, #tpu.memory_space<vmem>>, %arg2: memref<8x128xf32, #tpu.memory_space<vmem>>, %arg3: memref<8x1xf32, #tpu.memory_space<vmem>>, %arg4: memref<8x392xf32, #tpu.memory_space<vmem>>) attributes {dimension_semantics = [#tpu.dimension_semantics<arbitrary>], iteration_bounds = array<i64: 1>, scalar_prefetch = 0 : i64, scratch_operands = 0 : i64, tpu.core_type = #tpu.core_type<tc>, window_params = [{pipeline_mode = #tpu.pipeline_mode<synchronous>, transform_indices = @transform_0, window_bounds = array<i64: 4, 128, 392>}, {pipeline_mode = #tpu.pipeline_mode<synchronous>, transform_indices = @transform_1, window_bounds = array<i64: 8, 128>}, {pipeline_mode = #tpu.pipeline_mode<synchronous>, transform_indices = @transform_2, window_bounds = array<i64: 8, 1>}, {pipeline_mode = #tpu.pipeline_mode<synchronous>, transform_indices = @transform_3, window_bounds = array<i64: 8, 392>}]} {
    %c0 = arith.constant 0 : index
    %c0_0 = arith.constant 0 : index
    %0 = vector.load %arg2[%c0, %c0_0] : memref<8x128xf32, #tpu.memory_space<vmem>>, vector<8x128xf32>
    %c0_1 = arith.constant 0 : index
    %c0_2 = arith.constant 0 : index
    %c0_3 = arith.constant 0 : index
    %1 = vector.load %arg1[%c0_1, %c0_2, %c0_3] : memref<4x128x392xf32, #tpu.memory_space<vmem>>, vector<1x128x392xf32>
    %2 = vector.shape_cast %1 : vector<1x128x392xf32> to vector<128x392xf32>
    %cst = arith.constant dense<0.000000e+00> : vector<8x392xf32>
    %3 = tpu.matmul %0, %2, %cst {dimension_numbers = #tpu.dot_dimension_numbers<[1], [0], [0], [1], [0, 0, 1, 1], [], []>} : vector<8x128xf32>, vector<128x392xf32>, vector<8x392xf32> -> vector<8x392xf32>
    %c1 = arith.constant 1 : index
    %c0_4 = arith.constant 0 : index
    %c0_5 = arith.constant 0 : index
    %4 = vector.load %arg1[%c1, %c0_4, %c0_5] : memref<4x128x392xf32, #tpu.memory_space<vmem>>, vector<1x128x392xf32>
    %5 = vector.shape_cast %4 : vector<1x128x392xf32> to vector<128x392xf32>
    %cst_6 = arith.constant dense<0.000000e+00> : vector<8x392xf32>
    %6 = tpu.matmul %0, %5, %cst_6 {dimension_numbers = #tpu.dot_dimension_numbers<[1], [0], [0], [1], [0, 0, 1, 1], [], []>} : vector<8x128xf32>, vector<128x392xf32>, vector<8x392xf32> -> vector<8x392xf32>
    %7 = arith.maximumf %3, %6 : vector<8x392xf32>
    %c2 = arith.constant 2 : index
    %c0_7 = arith.constant 0 : index
    %c0_8 = arith.constant 0 : index
    %8 = vector.load %arg1[%c2, %c0_7, %c0_8] : memref<4x128x392xf32, #tpu.memory_space<vmem>>, vector<1x128x392xf32>
    %9 = vector.shape_cast %8 : vector<1x128x392xf32> to vector<128x392xf32>
    %cst_9 = arith.constant dense<0.000000e+00> : vector<8x392xf32>
    %10 = tpu.matmul %0, %9, %cst_9 {dimension_numbers = #tpu.dot_dimension_numbers<[1], [0], [0], [1], [0, 0, 1, 1], [], []>} : vector<8x128xf32>, vector<128x392xf32>, vector<8x392xf32> -> vector<8x392xf32>
    %11 = arith.maximumf %7, %10 : vector<8x392xf32>
    %c3 = arith.constant 3 : index
    %c0_10 = arith.constant 0 : index
    %c0_11 = arith.constant 0 : index
    %12 = vector.load %arg1[%c3, %c0_10, %c0_11] : memref<4x128x392xf32, #tpu.memory_space<vmem>>, vector<1x128x392xf32>
    %13 = vector.shape_cast %12 : vector<1x128x392xf32> to vector<128x392xf32>
    %cst_12 = arith.constant dense<0.000000e+00> : vector<8x392xf32>
    %14 = tpu.matmul %0, %13, %cst_12 {dimension_numbers = #tpu.dot_dimension_numbers<[1], [0], [0], [1], [0, 0, 1, 1], [], []>} : vector<8x128xf32>, vector<128x392xf32>, vector<8x392xf32> -> vector<8x392xf32>
    %15 = arith.maximumf %11, %14 : vector<8x392xf32>
    %c0_13 = arith.constant 0 : index
    %c0_14 = arith.constant 0 : index
    %16 = vector.load %arg3[%c0_13, %c0_14] : memref<8x1xf32, #tpu.memory_space<vmem>>, vector<8x1xf32>
    %17 = vector.broadcast %16 : vector<8x1xf32> to vector<8x392xf32>
    %18 = arith.addf %15, %17 : vector<8x392xf32>
    %cst_15 = arith.constant 0.000000e+00 : f32
    %19 = vector.broadcast %cst_15 : f32 to vector<8x392xf32>
    %20 = arith.maximumf %18, %19 : vector<8x392xf32>
    %c0_16 = arith.constant 0 : index
    %c0_17 = arith.constant 0 : index
    %21 = vector.load %arg4[%c0_16, %c0_17] : memref<8x392xf32, #tpu.memory_space<vmem>>, vector<8x392xf32>
    tpu.vector_store %arg4[%c0_16, %c0_17], %20 {strides = array<i32>} : memref<8x392xf32, #tpu.memory_space<vmem>>, vector<8x392xf32>,
    return
  }
  func.func @transform_0(%arg0: i32) -> (i32, i32, i32) {
    %c0_i32 = arith.constant 0 : i32
    %c0_i32_0 = arith.constant 0 : i32
    %c0_i32_1 = arith.constant 0 : i32
    %c0_i32_2 = arith.constant 0 : i32
    return %c0_i32, %c0_i32_0, %c0_i32_1 : i32, i32, i32
  }
  func.func @transform_1(%arg0: i32) -> (i32, i32) {
    %c0_i32 = arith.constant 0 : i32
    %c0_i32_0 = arith.constant 0 : i32
    %c0_i32_1 = arith.constant 0 : i32
    return %c0_i32, %c0_i32_0 : i32, i32
  }
  func.func @transform_2(%arg0: i32) -> (i32, i32) {
    %c0_i32 = arith.constant 0 : i32
    %c0_i32_0 = arith.constant 0 : i32
    %c0_i32_1 = arith.constant 0 : i32
    return %c0_i32, %c0_i32_0 : i32, i32
  }
  func.func @transform_3(%arg0: i32) -> (i32, i32) {
    %c0_i32 = arith.constant 0 : i32
    %c0_i32_0 = arith.constant 0 : i32
    %c0_i32_1 = arith.constant 0 : i32
    return %c0_i32, %c0_i32_0 : i32, i32
  }
}

module attributes {stable_mosaic.version = 11 : i64} {
  func.func @_conv_pool_kernel(%arg0: i32, %arg1: memref<4x256x98xf32, #tpu.memory_space<vmem>>, %arg2: memref<16x256xf32, #tpu.memory_space<vmem>>, %arg3: memref<16x1xf32, #tpu.memory_space<vmem>>, %arg4: memref<16x98xf32, #tpu.memory_space<vmem>>) attributes {dimension_semantics = [#tpu.dimension_semantics<arbitrary>], iteration_bounds = array<i64: 1>, scalar_prefetch = 0 : i64, scratch_operands = 0 : i64, tpu.core_type = #tpu.core_type<tc>, window_params = [{pipeline_mode = #tpu.pipeline_mode<synchronous>, transform_indices = @transform_0, window_bounds = array<i64: 4, 256, 98>}, {pipeline_mode = #tpu.pipeline_mode<synchronous>, transform_indices = @transform_1, window_bounds = array<i64: 16, 256>}, {pipeline_mode = #tpu.pipeline_mode<synchronous>, transform_indices = @transform_2, window_bounds = array<i64: 16, 1>}, {pipeline_mode = #tpu.pipeline_mode<synchronous>, transform_indices = @transform_3, window_bounds = array<i64: 16, 98>}]} {
    %c0 = arith.constant 0 : index
    %c0_0 = arith.constant 0 : index
    %0 = vector.load %arg2[%c0, %c0_0] : memref<16x256xf32, #tpu.memory_space<vmem>>, vector<16x256xf32>
    %c0_1 = arith.constant 0 : index
    %c0_2 = arith.constant 0 : index
    %c0_3 = arith.constant 0 : index
    %1 = vector.load %arg1[%c0_1, %c0_2, %c0_3] : memref<4x256x98xf32, #tpu.memory_space<vmem>>, vector<1x256x98xf32>
    %2 = vector.shape_cast %1 : vector<1x256x98xf32> to vector<256x98xf32>
    %cst = arith.constant dense<0.000000e+00> : vector<16x98xf32>
    %3 = tpu.matmul %0, %2, %cst {dimension_numbers = #tpu.dot_dimension_numbers<[1], [0], [0], [1], [0, 0, 1, 1], [], []>} : vector<16x256xf32>, vector<256x98xf32>, vector<16x98xf32> -> vector<16x98xf32>
    %c1 = arith.constant 1 : index
    %c0_4 = arith.constant 0 : index
    %c0_5 = arith.constant 0 : index
    %4 = vector.load %arg1[%c1, %c0_4, %c0_5] : memref<4x256x98xf32, #tpu.memory_space<vmem>>, vector<1x256x98xf32>
    %5 = vector.shape_cast %4 : vector<1x256x98xf32> to vector<256x98xf32>
    %cst_6 = arith.constant dense<0.000000e+00> : vector<16x98xf32>
    %6 = tpu.matmul %0, %5, %cst_6 {dimension_numbers = #tpu.dot_dimension_numbers<[1], [0], [0], [1], [0, 0, 1, 1], [], []>} : vector<16x256xf32>, vector<256x98xf32>, vector<16x98xf32> -> vector<16x98xf32>
    %7 = arith.maximumf %3, %6 : vector<16x98xf32>
    %c2 = arith.constant 2 : index
    %c0_7 = arith.constant 0 : index
    %c0_8 = arith.constant 0 : index
    %8 = vector.load %arg1[%c2, %c0_7, %c0_8] : memref<4x256x98xf32, #tpu.memory_space<vmem>>, vector<1x256x98xf32>
    %9 = vector.shape_cast %8 : vector<1x256x98xf32> to vector<256x98xf32>
    %cst_9 = arith.constant dense<0.000000e+00> : vector<16x98xf32>
    %10 = tpu.matmul %0, %9, %cst_9 {dimension_numbers = #tpu.dot_dimension_numbers<[1], [0], [0], [1], [0, 0, 1, 1], [], []>} : vector<16x256xf32>, vector<256x98xf32>, vector<16x98xf32> -> vector<16x98xf32>
    %11 = arith.maximumf %7, %10 : vector<16x98xf32>
    %c3 = arith.constant 3 : index
    %c0_10 = arith.constant 0 : index
    %c0_11 = arith.constant 0 : index
    %12 = vector.load %arg1[%c3, %c0_10, %c0_11] : memref<4x256x98xf32, #tpu.memory_space<vmem>>, vector<1x256x98xf32>
    %13 = vector.shape_cast %12 : vector<1x256x98xf32> to vector<256x98xf32>
    %cst_12 = arith.constant dense<0.000000e+00> : vector<16x98xf32>
    %14 = tpu.matmul %0, %13, %cst_12 {dimension_numbers = #tpu.dot_dimension_numbers<[1], [0], [0], [1], [0, 0, 1, 1], [], []>} : vector<16x256xf32>, vector<256x98xf32>, vector<16x98xf32> -> vector<16x98xf32>
    %15 = arith.maximumf %11, %14 : vector<16x98xf32>
    %c0_13 = arith.constant 0 : index
    %c0_14 = arith.constant 0 : index
    %16 = vector.load %arg3[%c0_13, %c0_14] : memref<16x1xf32, #tpu.memory_space<vmem>>, vector<16x1xf32>
    %17 = vector.broadcast %16 : vector<16x1xf32> to vector<16x98xf32>
    %18 = arith.addf %15, %17 : vector<16x98xf32>
    %cst_15 = arith.constant 0.000000e+00 : f32
    %19 = vector.broadcast %cst_15 : f32 to vector<16x98xf32>
    %20 = arith.maximumf %18, %19 : vector<16x98xf32>
    %c0_16 = arith.constant 0 : index
    %c0_17 = arith.constant 0 : index
    %21 = vector.load %arg4[%c0_16, %c0_17] : memref<16x98xf32, #tpu.memory_space<vmem>>, vector<16x98xf32>
    tpu.vector_store %arg4[%c0_16, %c0_17], %20 {strides = array<i32>} : memref<16x98xf32, #tpu.memory_space<vmem>>, vector<16x98xf32>,
    return
  }
  func.func @transform_0(%arg0: i32) -> (i32, i32, i32) {
    %c0_i32 = arith.constant 0 : i32
    %c0_i32_0 = arith.constant 0 : i32
    %c0_i32_1 = arith.constant 0 : i32
    %c0_i32_2 = arith.constant 0 : i32
    return %c0_i32, %c0_i32_0, %c0_i32_1 : i32, i32, i32
  }
  func.func @transform_1(%arg0: i32) -> (i32, i32) {
    %c0_i32 = arith.constant 0 : i32
    %c0_i32_0 = arith.constant 0 : i32
    %c0_i32_1 = arith.constant 0 : i32
    return %c0_i32, %c0_i32_0 : i32, i32
  }
  func.func @transform_2(%arg0: i32) -> (i32, i32) {
    %c0_i32 = arith.constant 0 : i32
    %c0_i32_0 = arith.constant 0 : i32
    %c0_i32_1 = arith.constant 0 : i32
    return %c0_i32, %c0_i32_0 : i32, i32
  }
  func.func @transform_3(%arg0: i32) -> (i32, i32) {
    %c0_i32 = arith.constant 0 : i32
    %c0_i32_0 = arith.constant 0 : i32
    %c0_i32_1 = arith.constant 0 : i32
    return %c0_i32, %c0_i32_0 : i32, i32
  }
}

module attributes {stable_mosaic.version = 11 : i64} {
  func.func @_mlp_kernel(%arg0: i32, %arg1: memref<2x784xf32, #tpu.memory_space<vmem>>, %arg2: memref<784x128xf32, #tpu.memory_space<vmem>>, %arg3: memref<1x128xf32, #tpu.memory_space<vmem>>, %arg4: memref<128x128xf32, #tpu.memory_space<vmem>>, %arg5: memref<1x128xf32, #tpu.memory_space<vmem>>, %arg6: memref<128x10xf32, #tpu.memory_space<vmem>>, %arg7: memref<1x10xf32, #tpu.memory_space<vmem>>, %arg8: memref<2x10xf32, #tpu.memory_space<vmem>>) attributes {dimension_semantics = [#tpu.dimension_semantics<arbitrary>], iteration_bounds = array<i64: 1>, scalar_prefetch = 0 : i64, scratch_operands = 0 : i64, tpu.core_type = #tpu.core_type<tc>, window_params = [{pipeline_mode = #tpu.pipeline_mode<synchronous>, transform_indices = @transform_0, window_bounds = array<i64: 2, 784>}, {pipeline_mode = #tpu.pipeline_mode<synchronous>, transform_indices = @transform_1, window_bounds = array<i64: 784, 128>}, {pipeline_mode = #tpu.pipeline_mode<synchronous>, transform_indices = @transform_2, window_bounds = array<i64: 1, 128>}, {pipeline_mode = #tpu.pipeline_mode<synchronous>, transform_indices = @transform_3, window_bounds = array<i64: 128, 128>}, {pipeline_mode = #tpu.pipeline_mode<synchronous>, transform_indices = @transform_4, window_bounds = array<i64: 1, 128>}, {pipeline_mode = #tpu.pipeline_mode<synchronous>, transform_indices = @transform_5, window_bounds = array<i64: 128, 10>}, {pipeline_mode = #tpu.pipeline_mode<synchronous>, transform_indices = @transform_6, window_bounds = array<i64: 1, 10>}, {pipeline_mode = #tpu.pipeline_mode<synchronous>, transform_indices = @transform_7, window_bounds = array<i64: 2, 10>}]} {
    %c0 = arith.constant 0 : index
    %c0_0 = arith.constant 0 : index
    %0 = vector.load %arg1[%c0, %c0_0] : memref<2x784xf32, #tpu.memory_space<vmem>>, vector<2x784xf32>
    %c0_1 = arith.constant 0 : index
    %c0_2 = arith.constant 0 : index
    %1 = vector.load %arg2[%c0_1, %c0_2] : memref<784x128xf32, #tpu.memory_space<vmem>>, vector<784x128xf32>
    %cst = arith.constant dense<0.000000e+00> : vector<2x128xf32>
    %2 = tpu.matmul %0, %1, %cst {dimension_numbers = #tpu.dot_dimension_numbers<[1], [0], [0], [1], [0, 0, 1, 1], [], []>} : vector<2x784xf32>, vector<784x128xf32>, vector<2x128xf32> -> vector<2x128xf32>
    %c0_3 = arith.constant 0 : index
    %c0_4 = arith.constant 0 : index
    %3 = vector.load %arg3[%c0_3, %c0_4] : memref<1x128xf32, #tpu.memory_space<vmem>>, vector<1x128xf32>
    %4 = vector.broadcast %3 : vector<1x128xf32> to vector<2x128xf32>
    %5 = arith.addf %2, %4 : vector<2x128xf32>
    %cst_5 = arith.constant 0.000000e+00 : f32
    %6 = vector.broadcast %cst_5 : f32 to vector<2x128xf32>
    %7 = arith.maximumf %5, %6 : vector<2x128xf32>
    %c0_6 = arith.constant 0 : index
    %c0_7 = arith.constant 0 : index
    %8 = vector.load %arg4[%c0_6, %c0_7] : memref<128x128xf32, #tpu.memory_space<vmem>>, vector<128x128xf32>
    %cst_8 = arith.constant dense<0.000000e+00> : vector<2x128xf32>
    %9 = tpu.matmul %7, %8, %cst_8 {dimension_numbers = #tpu.dot_dimension_numbers<[1], [0], [0], [1], [0, 0, 1, 1], [], []>} : vector<2x128xf32>, vector<128x128xf32>, vector<2x128xf32> -> vector<2x128xf32>
    %c0_9 = arith.constant 0 : index
    %c0_10 = arith.constant 0 : index
    %10 = vector.load %arg5[%c0_9, %c0_10] : memref<1x128xf32, #tpu.memory_space<vmem>>, vector<1x128xf32>
    %11 = vector.broadcast %10 : vector<1x128xf32> to vector<2x128xf32>
    %12 = arith.addf %9, %11 : vector<2x128xf32>
    %cst_11 = arith.constant 0.000000e+00 : f32
    %13 = vector.broadcast %cst_11 : f32 to vector<2x128xf32>
    %14 = arith.maximumf %12, %13 : vector<2x128xf32>
    %c0_12 = arith.constant 0 : index
    %c0_13 = arith.constant 0 : index
    %15 = vector.load %arg6[%c0_12, %c0_13] : memref<128x10xf32, #tpu.memory_space<vmem>>, vector<128x10xf32>
    %cst_14 = arith.constant dense<0.000000e+00> : vector<2x10xf32>
    %16 = tpu.matmul %14, %15, %cst_14 {dimension_numbers = #tpu.dot_dimension_numbers<[1], [0], [0], [1], [0, 0, 1, 1], [], []>} : vector<2x128xf32>, vector<128x10xf32>, vector<2x10xf32> -> vector<2x10xf32>
    %c0_15 = arith.constant 0 : index
    %c0_16 = arith.constant 0 : index
    %17 = vector.load %arg7[%c0_15, %c0_16] : memref<1x10xf32, #tpu.memory_space<vmem>>, vector<1x10xf32>
    %18 = vector.broadcast %17 : vector<1x10xf32> to vector<2x10xf32>
    %19 = arith.addf %16, %18 : vector<2x10xf32>
    %c0_17 = arith.constant 0 : index
    %c0_18 = arith.constant 0 : index
    %20 = vector.load %arg8[%c0_17, %c0_18] : memref<2x10xf32, #tpu.memory_space<vmem>>, vector<2x10xf32>
    tpu.vector_store %arg8[%c0_17, %c0_18], %19 {strides = array<i32>} : memref<2x10xf32, #tpu.memory_space<vmem>>, vector<2x10xf32>,
    return
  }
  func.func @transform_0(%arg0: i32) -> (i32, i32) {
    %c0_i32 = arith.constant 0 : i32
    %c0_i32_0 = arith.constant 0 : i32
    %c0_i32_1 = arith.constant 0 : i32
    return %c0_i32, %c0_i32_0 : i32, i32
  }
  func.func @transform_1(%arg0: i32) -> (i32, i32) {
    %c0_i32 = arith.constant 0 : i32
    %c0_i32_0 = arith.constant 0 : i32
    %c0_i32_1 = arith.constant 0 : i32
    return %c0_i32, %c0_i32_0 : i32, i32
  }
  func.func @transform_2(%arg0: i32) -> (i32, i32) {
    %c0_i32 = arith.constant 0 : i32
    %c0_i32_0 = arith.constant 0 : i32
    %c0_i32_1 = arith.constant 0 : i32
    return %c0_i32, %c0_i32_0 : i32, i32
  }
  func.func @transform_3(%arg0: i32) -> (i32, i32) {
    %c0_i32 = arith.constant 0 : i32
    %c0_i32_0 = arith.constant 0 : i32
    %c0_i32_1 = arith.constant 0 : i32
    return %c0_i32, %c0_i32_0 : i32, i32
  }
  func.func @transform_4(%arg0: i32) -> (i32, i32) {
    %c0_i32 = arith.constant 0 : i32
    %c0_i32_0 = arith.constant 0 : i32
    %c0_i32_1 = arith.constant 0 : i32
    return %c0_i32, %c0_i32_0 : i32, i32
  }
  func.func @transform_5(%arg0: i32) -> (i32, i32) {
    %c0_i32 = arith.constant 0 : i32
    %c0_i32_0 = arith.constant 0 : i32
    %c0_i32_1 = arith.constant 0 : i32
    return %c0_i32, %c0_i32_0 : i32, i32
  }
  func.func @transform_6(%arg0: i32) -> (i32, i32) {
    %c0_i32 = arith.constant 0 : i32
    %c0_i32_0 = arith.constant 0 : i32
    %c0_i32_1 = arith.constant 0 : i32
    return %c0_i32, %c0_i32_0 : i32, i32
  }
  func.func @transform_7(%arg0: i32) -> (i32, i32) {
    %c0_i32 = arith.constant 0 : i32
    %c0_i32_0 = arith.constant 0 : i32
    %c0_i32_1 = arith.constant 0 : i32
    return %c0_i32, %c0_i32_0 : i32, i32
  }
}

</mosaic_0001>

<bundles_post_ra>
// kernel: lenet_forward.3
= control target key start
LH: loop header
LB: loop body
LE: loop exit
PB: predicated region body
PF: predicated region fallthrough
CT: control target
= control target key end

     0   :  { %v1072_v3 = vmov 0.0   ;;  %vm871_vm0 = vcmask 64512   ;;  %s1898_s0 = inlined_call_operand.vmem [shape: f32[4,128,392], index: 0, kind: input, shape index: {}]   ;;  %s1899_s1 = inlined_call_operand.vmem [shape: f32[8,128], index: 1, kind: input, shape index: {}]   ;;  %s1900_s2 = inlined_call_operand.vmem [shape: f32[8,1], index: 2, kind: input, shape index: {}]   ;;  %s1901_s3 = inlined_call_operand.vmem [shape: f32[8,392], index: 3, kind: output, shape index: {}]  }
   0x1   :  { %v76_v0 = vld [vmem:[%s1898_s0 + $0x1e8] sm:$0xff]  ;;  %v78_v1 = vld [vmem:[%s1898_s0 + $0x1f8] sm:$0xff]  ;;  %v75_v2 = vld [vmem:[%s1898_s0 + $0x1e0] sm:$0xff]  ;;  %143 = vmatprep.mubr.f32.mxu0 %v1072_v3  ;;  %214 = vmatprep.mubr.f32.mxu1 %v1072_v3 }
   0x2   :  { %79 = vmatprep.subr.mxu0 %v76_v0  ;;  %150 = vmatprep.subr.mxu1 %v78_v1  ;;  %v77_v4 = vld [vmem:[%s1898_s0 + $0x1f0] sm:$0xff]  ;;  %v72_v5 = vld [vmem:[%s1898_s0 + $0x1c8] sm:$0xff]  ;;  %v74_v6 = vld [vmem:[%s1898_s0 + $0x1d8] sm:$0xff] }
   0x3   :  { %80 = vmatpush1.msra.mxu0 %v75_v2  ;;  %151 = vmatpush1.msra.mxu1 %v77_v4  ;;  %v71_v7 = vld [vmem:[%s1898_s0 + $0x1c0] sm:$0xff]  ;;  %v73_v8 = vld [vmem:[%s1898_s0 + $0x1d0] sm:$0xff]  ;;  %v68_v9 = vld [vmem:[%s1898_s0 + $0x1a8] sm:$0xff] }
   0x4   :  { %81 = vmatprep.subr.mxu0 %v72_v5  ;;  %152 = vmatprep.subr.mxu1 %v74_v6  ;;  %v70_v10 = vld [vmem:[%s1898_s0 + $0x1b8] sm:$0xff]  ;;  %v67_v11 = vld [vmem:[%s1898_s0 + $0x1a0] sm:$0xff]  ;;  %v69_v12 = vld [vmem:[%s1898_s0 + $0x1b0] sm:$0xff] }
   0x5   :  { %82 = vmatpush1.msra.mxu0 %v71_v7  ;;  %153 = vmatpush1.msra.mxu1 %v73_v8  ;;  %v64_v13 = vld [vmem:[%s1898_s0 + $0x188] sm:$0xff]  ;;  %v66_v14 = vld [vmem:[%s1898_s0 + $0x198] sm:$0xff]  ;;  %v63_v15 = vld [vmem:[%s1898_s0 + $0x180] sm:$0xff] }
   0x6   :  { %83 = vmatprep.subr.mxu0 %v68_v9  ;;  %154 = vmatprep.subr.mxu1 %v70_v10  ;;  %v65_v16 = vld [vmem:[%s1898_s0 + $0x190] sm:$0xff]  ;;  %v60_v17 = vld [vmem:[%s1898_s0 + $0x168] sm:$0xff]  ;;  %v62_v18 = vld [vmem:[%s1898_s0 + $0x178] sm:$0xff] }
   0x7   :  { %84 = vmatpush1.msra.mxu0 %v67_v11  ;;  %155 = vmatpush1.msra.mxu1 %v69_v12  ;;  %v59_v19 = vld [vmem:[%s1898_s0 + $0x160] sm:$0xff]  ;;  %v61_v20 = vld [vmem:[%s1898_s0 + $0x170] sm:$0xff]  ;;  %v56_v21 = vld [vmem:[%s1898_s0 + $0x148] sm:$0xff] }
   0x8   :  { %85 = vmatprep.subr.mxu0 %v64_v13  ;;  %156 = vmatprep.subr.mxu1 %v66_v14  ;;  %v58_v22 = vld [vmem:[%s1898_s0 + $0x158] sm:$0xff]  ;;  %v55_v23 = vld [vmem:[%s1898_s0 + $0x140] sm:$0xff]  ;;  %v57_v24 = vld [vmem:[%s1898_s0 + $0x150] sm:$0xff] }
   0x9   :  { %86 = vmatpush1.msra.mxu0 %v63_v15  ;;  %157 = vmatpush1.msra.mxu1 %v65_v16  ;;  %v52_v25 = vld [vmem:[%s1898_s0 + $0x128] sm:$0xff]  ;;  %v54_v26 = vld [vmem:[%s1898_s0 + $0x138] sm:$0xff]  ;;  %v51_v27 = vld [vmem:[%s1898_s0 + $0x120] sm:$0xff] }
   0xa   :  { %87 = vmatprep.subr.mxu0 %v60_v17  ;;  %158 = vmatprep.subr.mxu1 %v62_v18  ;;  %v53_v28 = vld [vmem:[%s1898_s0 + $0x130] sm:$0xff]  ;;  %v48_v29 = vld [vmem:[%s1898_s0 + $0x108] sm:$0xff]  ;;  %v50_v30 = vld [vmem:[%s1898_s0 + $0x118] sm:$0xff] }
   0xb   :  { %88 = vmatpush1.msra.mxu0 %v59_v19  ;;  %159 = vmatpush1.msra.mxu1 %v61_v20  ;;  %v47_v31 = vld [vmem:[%s1898_s0 + $0x100] sm:$0xff]  ;;  %v49_v32 = vld [vmem:[%s1898_s0 + $0x110] sm:$0xff]  ;;  %v44_v33 = vld [vmem:[%s1898_s0 + $0xe8] sm:$0xff] }
   0xc   :  { %89 = vmatprep.subr.mxu0 %v56_v21  ;;  %160 = vmatprep.subr.mxu1 %v58_v22  ;;  %v46_v34 = vld [vmem:[%s1898_s0 + $0xf8] sm:$0xff]  ;;  %v43_v35 = vld [vmem:[%s1898_s0 + $0xe0] sm:$0xff]  ;;  %v45_v36 = vld [vmem:[%s1898_s0 + $0xf0] sm:$0xff] }
   0xd   :  { %90 = vmatpush1.msra.mxu0 %v55_v23  ;;  %161 = vmatpush1.msra.mxu1 %v57_v24  ;;  %v40_v37 = vld [vmem:[%s1898_s0 + $0xc8] sm:$0xff]  ;;  %v42_v38 = vld [vmem:[%s1898_s0 + $0xd8] sm:$0xff]  ;;  %v39_v39 = vld [vmem:[%s1898_s0 + $0xc0] sm:$0xff] }
   0xe   :  { %91 = vmatprep.subr.mxu0 %v52_v25  ;;  %162 = vmatprep.subr.mxu1 %v54_v26  ;;  %v41_v40 = vld [vmem:[%s1898_s0 + $0xd0] sm:$0xff]  ;;  %v36_v41 = vld [vmem:[%s1898_s0 + $0xa8] sm:$0xff]  ;;  %v38_v42 = vld [vmem:[%s1898_s0 + $0xb8] sm:$0xff] }
   0xf   :  { %92 = vmatpush1.msra.mxu0 %v51_v27  ;;  %163 = vmatpush1.msra.mxu1 %v53_v28  ;;  %v35_v43 = vld [vmem:[%s1898_s0 + $0xa0] sm:$0xff]  ;;  %v37_v44 = vld [vmem:[%s1898_s0 + $0xb0] sm:$0xff]  ;;  %v32_v45 = vld [vmem:[%s1898_s0 + $0x88] sm:$0xff] }
  0x10   :  { %93 = vmatprep.subr.mxu0 %v48_v29  ;;  %164 = vmatprep.subr.mxu1 %v50_v30  ;;  %v34_v46 = vld [vmem:[%s1898_s0 + $0x98] sm:$0xff]  ;;  %v31_v47 = vld [vmem:[%s1898_s0 + $0x80] sm:$0xff]  ;;  %v33_v48 = vld [vmem:[%s1898_s0 + $0x90] sm:$0xff] }
  0x11   :  { %94 = vmatpush1.msra.mxu0 %v47_v31  ;;  %165 = vmatpush1.msra.mxu1 %v49_v32  ;;  %v28_v49 = vld [vmem:[%s1898_s0 + $0x68] sm:$0xff]  ;;  %v30_v50 = vld [vmem:[%s1898_s0 + $0x78] sm:$0xff]  ;;  %v27_v51 = vld [vmem:[%s1898_s0 + $0x60] sm:$0xff] }
  0x12   :  { %95 = vmatprep.subr.mxu0 %v44_v33  ;;  %166 = vmatprep.subr.mxu1 %v46_v34  ;;  %v29_v52 = vld [vmem:[%s1898_s0 + $0x70] sm:$0xff]  ;;  %v24_v53 = vld [vmem:[%s1898_s0 + $0x48] sm:$0xff]  ;;  %v26_v54 = vld [vmem:[%s1898_s0 + $0x58] sm:$0xff] }
  0x13   :  { %96 = vmatpush1.msra.mxu0 %v43_v35  ;;  %167 = vmatpush1.msra.mxu1 %v45_v36  ;;  %v23_v55 = vld [vmem:[%s1898_s0 + $0x40] sm:$0xff]  ;;  %v25_v56 = vld [vmem:[%s1898_s0 + $0x50] sm:$0xff]  ;;  %v20_v57 = vld [vmem:[%s1898_s0 + $0x28] sm:$0xff] }
  0x14   :  { %97 = vmatprep.subr.mxu0 %v40_v37  ;;  %168 = vmatprep.subr.mxu1 %v42_v38  ;;  %v22_v58 = vld [vmem:[%s1898_s0 + $0x38] sm:$0xff]  ;;  %v19_v59 = vld [vmem:[%s1898_s0 + $0x20] sm:$0xff]  ;;  %v21_v60 = vld [vmem:[%s1898_s0 + $0x30] sm:$0xff] }
  0x15   :  { %98 = vmatpush1.msra.mxu0 %v39_v39  ;;  %169 = vmatpush1.msra.mxu1 %v41_v40  ;;  %v16_v61 = vld [vmem:[%s1898_s0 + $0x8] sm:$0xff]  ;;  %v18_v62 = vld [vmem:[%s1898_s0 + $0x18] sm:$0xff]  ;;  %v15_v63 = vld [vmem:[%s1898_s0] sm:$0xff] }
  0x16   :  { %99 = vmatprep.subr.mxu0 %v36_v41  ;;  %170 = vmatprep.subr.mxu1 %v38_v42  ;;  %v17_v0 = vld [vmem:[%s1898_s0 + $0x10] sm:$0xff]  ;;  %v1291_v1 = vld [vmem:[%s1899_s1] sm:$0xff]  ;;  %v938_v2 = vld [vmem:[%s1898_s0 + $0x3e8] sm:$0xff] }
  0x17   :  { %100 = vmatpush1.msra.mxu0 %v35_v43  ;;  %171 = vmatpush1.msra.mxu1 %v37_v44  ;;  %v940_v4 = vld [vmem:[%s1898_s0 + $0x3f8] sm:$0xff]  ;;  %v937_v5 = vld [vmem:[%s1898_s0 + $0x3e0] sm:$0xff]  ;;  %v939_v6 = vld [vmem:[%s1898_s0 + $0x3f0] sm:$0xff] }
  0x18   :  { %101 = vmatprep.subr.mxu0 %v32_v45  ;;  %172 = vmatprep.subr.mxu1 %v34_v46  ;;  %v934_v7 = vld [vmem:[%s1898_s0 + $0x3c8] sm:$0xff]  ;;  %v936_v8 = vld [vmem:[%s1898_s0 + $0x3d8] sm:$0xff]  ;;  %v933_v9 = vld [vmem:[%s1898_s0 + $0x3c0] sm:$0xff] }
  0x19   :  { %102 = vmatpush1.msra.mxu0 %v31_v47  ;;  %173 = vmatpush1.msra.mxu1 %v33_v48  ;;  %v935_v10 = vld [vmem:[%s1898_s0 + $0x3d0] sm:$0xff]  ;;  %v930_v11 = vld [vmem:[%s1898_s0 + $0x3a8] sm:$0xff]  ;;  %v932_v12 = vld [vmem:[%s1898_s0 + $0x3b8] sm:$0xff] }
  0x1a   :  { %103 = vmatprep.subr.mxu0 %v28_v49  ;;  %174 = vmatprep.subr.mxu1 %v30_v50  ;;  %v929_v13 = vld [vmem:[%s1898_s0 + $0x3a0] sm:$0xff]  ;;  %v931_v14 = vld [vmem:[%s1898_s0 + $0x3b0] sm:$0xff]  ;;  %v926_v15 = vld [vmem:[%s1898_s0 + $0x388] sm:$0xff] }
  0x1b   :  { %104 = vmatpush1.msra.mxu0 %v27_v51  ;;  %175 = vmatpush1.msra.mxu1 %v29_v52  ;;  %v928_v16 = vld [vmem:[%s1898_s0 + $0x398] sm:$0xff]  ;;  %v925_v17 = vld [vmem:[%s1898_s0 + $0x380] sm:$0xff]  ;;  %v927_v18 = vld [vmem:[%s1898_s0 + $0x390] sm:$0xff] }
  0x1c   :  { %105 = vmatprep.subr.mxu0 %v24_v53  ;;  %176 = vmatprep.subr.mxu1 %v26_v54  ;;  %v922_v19 = vld [vmem:[%s1898_s0 + $0x368] sm:$0xff]  ;;  %v924_v20 = vld [vmem:[%s1898_s0 + $0x378] sm:$0xff]  ;;  %v921_v21 = vld [vmem:[%s1898_s0 + $0x360] sm:$0xff] }
  0x1d   :  { %106 = vmatpush1.msra.mxu0 %v23_v55  ;;  %177 = vmatpush1.msra.mxu1 %v25_v56  ;;  %v923_v22 = vld [vmem:[%s1898_s0 + $0x370] sm:$0xff]  ;;  %v918_v23 = vld [vmem:[%s1898_s0 + $0x348] sm:$0xff]  ;;  %v920_v24 = vld [vmem:[%s1898_s0 + $0x358] sm:$0xff] }
  0x1e   :  { %107 = vmatprep.subr.mxu0 %v20_v57  ;;  %178 = vmatprep.subr.mxu1 %v22_v58  ;;  %v917_v25 = vld [vmem:[%s1898_s0 + $0x340] sm:$0xff]  ;;  %v919_v26 = vld [vmem:[%s1898_s0 + $0x350] sm:$0xff]  ;;  %v914_v27 = vld [vmem:[%s1898_s0 + $0x328] sm:$0xff] }
  0x1f   :  { %108 = vmatpush1.msra.mxu0 %v19_v59  ;;  %179 = vmatpush1.msra.mxu1 %v21_v60  ;;  %v916_v28 = vld [vmem:[%s1898_s0 + $0x338] sm:$0xff]  ;;  %v913_v29 = vld [vmem:[%s1898_s0 + $0x320] sm:$0xff]  ;;  %v915_v30 = vld [vmem:[%s1898_s0 + $0x330] sm:$0xff] }
  0x20   :  { %109 = vmatprep.subr.mxu0 %v16_v61  ;;  %180 = vmatprep.subr.mxu1 %v18_v62  ;;  %v910_v31 = vld [vmem:[%s1898_s0 + $0x308] sm:$0xff]  ;;  %v912_v32 = vld [vmem:[%s1898_s0 + $0x318] sm:$0xff]  ;;  %v909_v33 = vld [vmem:[%s1898_s0 + $0x300] sm:$0xff] }
  0x21   :  { %110 = vmatpush1.msra.mxu0 %v15_v63  ;;  %181 = vmatpush1.msra.mxu1 %v17_v0  ;;  %v911_v34 = vld [vmem:[%s1898_s0 + $0x310] sm:$0xff]  ;;  %v906_v35 = vld [vmem:[%s1898_s0 + $0x2e8] sm:$0xff]  ;;  %v908_v36 = vld [vmem:[%s1898_s0 + $0x2f8] sm:$0xff] }
  0x22   :  { %144 = vmatmul.mubr.f32.vlgmr.msra.gmra.mxu0 %v1291_v1  ;;  %215 = vmatmul.mubr.f32.vlgmr.msra.gmra.mxu1 %v1291_v1  ;;  %v905_v37 = vld [vmem:[%s1898_s0 + $0x2e0] sm:$0xff]  ;;  %v907_v38 = vld [vmem:[%s1898_s0 + $0x2f0] sm:$0xff]  ;;  %v902_v39 = vld [vmem:[%s1898_s0 + $0x2c8] sm:$0xff] }
  0x23   :  { %286 = vmatprep.subr.mxu0 %v938_v2  ;;  %357 = vmatprep.subr.mxu1 %v940_v4  ;;  %v904_v40 = vld [vmem:[%s1898_s0 + $0x2d8] sm:$0xff]  ;;  %v901_v41 = vld [vmem:[%s1898_s0 + $0x2c0] sm:$0xff]  ;;  %v903_v42 = vld [vmem:[%s1898_s0 + $0x2d0] sm:$0xff] }
  0x24   :  { %287 = vmatpush1.msra.mxu0 %v937_v5  ;;  %358 = vmatpush1.msra.mxu1 %v939_v6  ;;  %v898_v43 = vld [vmem:[%s1898_s0 + $0x2a8] sm:$0xff]  ;;  %v900_v44 = vld [vmem:[%s1898_s0 + $0x2b8] sm:$0xff]  ;;  %v897_v45 = vld [vmem:[%s1898_s0 + $0x2a0] sm:$0xff] }
  0x25   :  { %288 = vmatprep.subr.mxu0 %v934_v7  ;;  %359 = vmatprep.subr.mxu1 %v936_v8  ;;  %v899_v46 = vld [vmem:[%s1898_s0 + $0x2b0] sm:$0xff]  ;;  %v894_v47 = vld [vmem:[%s1898_s0 + $0x288] sm:$0xff]  ;;  %v896_v48 = vld [vmem:[%s1898_s0 + $0x298] sm:$0xff] }
  0x26   :  { %289 = vmatpush1.msra.mxu0 %v933_v9  ;;  %360 = vmatpush1.msra.mxu1 %v935_v10  ;;  %v893_v49 = vld [vmem:[%s1898_s0 + $0x280] sm:$0xff]  ;;  %v895_v50 = vld [vmem:[%s1898_s0 + $0x290] sm:$0xff]  ;;  %v890_v51 = vld [vmem:[%s1898_s0 + $0x268] sm:$0xff] }
  0x27   :  { %290 = vmatprep.subr.mxu0 %v930_v11  ;;  %361 = vmatprep.subr.mxu1 %v932_v12  ;;  %v892_v52 = vld [vmem:[%s1898_s0 + $0x278] sm:$0xff]  ;;  %v889_v53 = vld [vmem:[%s1898_s0 + $0x260] sm:$0xff]  ;;  %v891_v54 = vld [vmem:[%s1898_s0 + $0x270] sm:$0xff] }
  0x28   :  { %291 = vmatpush1.msra.mxu0 %v929_v13  ;;  %362 = vmatpush1.msra.mxu1 %v931_v14  ;;  %v886_v55 = vld [vmem:[%s1898_s0 + $0x248] sm:$0xff]  ;;  %v888_v56 = vld [vmem:[%s1898_s0 + $0x258] sm:$0xff]  ;;  %v885_v57 = vld [vmem:[%s1898_s0 + $0x240] sm:$0xff] }
  0x29   :  { %292 = vmatprep.subr.mxu0 %v926_v15  ;;  %363 = vmatprep.subr.mxu1 %v928_v16  ;;  %v887_v58 = vld [vmem:[%s1898_s0 + $0x250] sm:$0xff]  ;;  %v882_v59 = vld [vmem:[%s1898_s0 + $0x228] sm:$0xff]  ;;  %v884_v60 = vld [vmem:[%s1898_s0 + $0x238] sm:$0xff] }
  0x2a   :  { %293 = vmatpush1.msra.mxu0 %v925_v17  ;;  %364 = vmatpush1.msra.mxu1 %v927_v18  ;;  %v881_v61 = vld [vmem:[%s1898_s0 + $0x220] sm:$0xff]  ;;  %v883_v62 = vld [vmem:[%s1898_s0 + $0x230] sm:$0xff]  ;;  %v878_v63 = vld [vmem:[%s1898_s0 + $0x208] sm:$0xff] }
  0x2b   :  { %294 = vmatprep.subr.mxu0 %v922_v19  ;;  %365 = vmatprep.subr.mxu1 %v924_v20  ;;  %v880_v0 = vld [vmem:[%s1898_s0 + $0x218] sm:$0xff]  ;;  %v877_v2 = vld [vmem:[%s1898_s0 + $0x200] sm:$0xff]  ;;  %v879_v4 = vld [vmem:[%s1898_s0 + $0x210] sm:$0xff] }
  0x2c   :  { %295 = vmatpush1.msra.mxu0 %v921_v21  ;;  %366 = vmatpush1.msra.mxu1 %v923_v22  ;;  %v1002_v5 = vld [vmem:[%s1898_s0 + $0x5e8] sm:$0xff]  ;;  %v1004_v6 = vld [vmem:[%s1898_s0 + $0x5f8] sm:$0xff]  ;;  %v1001_v7 = vld [vmem:[%s1898_s0 + $0x5e0] sm:$0xff] }
  0x2d   :  { %296 = vmatprep.subr.mxu0 %v918_v23  ;;  %367 = vmatprep.subr.mxu1 %v920_v24  ;;  %v1003_v8 = vld [vmem:[%s1898_s0 + $0x5f0] sm:$0xff]  ;;  %v998_v9 = vld [vmem:[%s1898_s0 + $0x5c8] sm:$0xff]  ;;  %v1000_v10 = vld [vmem:[%s1898_s0 + $0x5d8] sm:$0xff] }
  0x2e   :  { %297 = vmatpush1.msra.mxu0 %v917_v25  ;;  %368 = vmatpush1.msra.mxu1 %v919_v26  ;;  %v997_v11 = vld [vmem:[%s1898_s0 + $0x5c0] sm:$0xff]  ;;  %v999_v12 = vld [vmem:[%s1898_s0 + $0x5d0] sm:$0xff]  ;;  %v994_v13 = vld [vmem:[%s1898_s0 + $0x5a8] sm:$0xff] }
  0x2f   :  { %298 = vmatprep.subr.mxu0 %v914_v27  ;;  %369 = vmatprep.subr.mxu1 %v916_v28  ;;  %v996_v14 = vld [vmem:[%s1898_s0 + $0x5b8] sm:$0xff]  ;;  %v993_v15 = vld [vmem:[%s1898_s0 + $0x5a0] sm:$0xff]  ;;  %v995_v16 = vld [vmem:[%s1898_s0 + $0x5b0] sm:$0xff] }
  0x30   :  { %299 = vmatpush1.msra.mxu0 %v913_v29  ;;  %370 = vmatpush1.msra.mxu1 %v915_v30  ;;  %v990_v17 = vld [vmem:[%s1898_s0 + $0x588] sm:$0xff]  ;;  %v992_v18 = vld [vmem:[%s1898_s0 + $0x598] sm:$0xff]  ;;  %v989_v19 = vld [vmem:[%s1898_s0 + $0x580] sm:$0xff] }
  0x31   :  { %300 = vmatprep.subr.mxu0 %v910_v31  ;;  %371 = vmatprep.subr.mxu1 %v912_v32  ;;  %v991_v20 = vld [vmem:[%s1898_s0 + $0x590] sm:$0xff]  ;;  %v986_v21 = vld [vmem:[%s1898_s0 + $0x568] sm:$0xff]  ;;  %v988_v22 = vld [vmem:[%s1898_s0 + $0x578] sm:$0xff] }
  0x32   :  { %301 = vmatpush1.msra.mxu0 %v909_v33  ;;  %372 = vmatpush1.msra.mxu1 %v911_v34  ;;  %v985_v23 = vld [vmem:[%s1898_s0 + $0x560] sm:$0xff]  ;;  %v987_v24 = vld [vmem:[%s1898_s0 + $0x570] sm:$0xff]  ;;  %v982_v25 = vld [vmem:[%s1898_s0 + $0x548] sm:$0xff] }
  0x33   :  { %302 = vmatprep.subr.mxu0 %v906_v35  ;;  %373 = vmatprep.subr.mxu1 %v908_v36  ;;  %v984_v26 = vld [vmem:[%s1898_s0 + $0x558] sm:$0xff]  ;;  %v981_v27 = vld [vmem:[%s1898_s0 + $0x540] sm:$0xff]  ;;  %v983_v28 = vld [vmem:[%s1898_s0 + $0x550] sm:$0xff] }
  0x34   :  { %303 = vmatpush1.msra.mxu0 %v905_v37  ;;  %374 = vmatpush1.msra.mxu1 %v907_v38  ;;  %v978_v29 = vld [vmem:[%s1898_s0 + $0x528] sm:$0xff]  ;;  %v980_v30 = vld [vmem:[%s1898_s0 + $0x538] sm:$0xff]  ;;  %v977_v31 = vld [vmem:[%s1898_s0 + $0x520] sm:$0xff] }
  0x35   :  { %304 = vmatprep.subr.mxu0 %v902_v39  ;;  %375 = vmatprep.subr.mxu1 %v904_v40  ;;  %v979_v32 = vld [vmem:[%s1898_s0 + $0x530] sm:$0xff]  ;;  %v974_v33 = vld [vmem:[%s1898_s0 + $0x508] sm:$0xff]  ;;  %v976_v34 = vld [vmem:[%s1898_s0 + $0x518] sm:$0xff] }
  0x36   :  { %305 = vmatpush1.msra.mxu0 %v901_v41  ;;  %376 = vmatpush1.msra.mxu1 %v903_v42  ;;  %v973_v35 = vld [vmem:[%s1898_s0 + $0x500] sm:$0xff]  ;;  %v975_v36 = vld [vmem:[%s1898_s0 + $0x510] sm:$0xff]  ;;  %v970_v37 = vld [vmem:[%s1898_s0 + $0x4e8] sm:$0xff] }
  0x37   :  { %306 = vmatprep.subr.mxu0 %v898_v43  ;;  %377 = vmatprep.subr.mxu1 %v900_v44  ;;  %v972_v38 = vld [vmem:[%s1898_s0 + $0x4f8] sm:$0xff]  ;;  %v969_v39 = vld [vmem:[%s1898_s0 + $0x4e0] sm:$0xff]  ;;  %v971_v40 = vld [vmem:[%s1898_s0 + $0x4f0] sm:$0xff] }
  0x38   :  { %307 = vmatpush1.msra.mxu0 %v897_v45  ;;  %378 = vmatpush1.msra.mxu1 %v899_v46  ;;  %v966_v41 = vld [vmem:[%s1898_s0 + $0x4c8] sm:$0xff]  ;;  %v968_v42 = vld [vmem:[%s1898_s0 + $0x4d8] sm:$0xff]  ;;  %v965_v43 = vld [vmem:[%s1898_s0 + $0x4c0] sm:$0xff] }
  0x39   :  { %308 = vmatprep.subr.mxu0 %v894_v47  ;;  %379 = vmatprep.subr.mxu1 %v896_v48  ;;  %v967_v44 = vld [vmem:[%s1898_s0 + $0x4d0] sm:$0xff]  ;;  %v962_v45 = vld [vmem:[%s1898_s0 + $0x4a8] sm:$0xff]  ;;  %v964_v46 = vld [vmem:[%s1898_s0 + $0x4b8] sm:$0xff] }
  0x3a   :  { %309 = vmatpush1.msra.mxu0 %v893_v49  ;;  %380 = vmatpush1.msra.mxu1 %v895_v50  ;;  %v961_v47 = vld [vmem:[%s1898_s0 + $0x4a0] sm:$0xff]  ;;  %v963_v48 = vld [vmem:[%s1898_s0 + $0x4b0] sm:$0xff]  ;;  %v958_v49 = vld [vmem:[%s1898_s0 + $0x488] sm:$0xff] }
  0x3b   :  { %310 = vmatprep.subr.mxu0 %v890_v51  ;;  %381 = vmatprep.subr.mxu1 %v892_v52  ;;  %v960_v50 = vld [vmem:[%s1898_s0 + $0x498] sm:$0xff]  ;;  %v957_v51 = vld [vmem:[%s1898_s0 + $0x480] sm:$0xff]  ;;  %v959_v52 = vld [vmem:[%s1898_s0 + $0x490] sm:$0xff] }
  0x3c   :  { %311 = vmatpush1.msra.mxu0 %v889_v53  ;;  %382 = vmatpush1.msra.mxu1 %v891_v54  ;;  %v954_v53 = vld [vmem:[%s1898_s0 + $0x468] sm:$0xff]  ;;  %v956_v54 = vld [vmem:[%s1898_s0 + $0x478] sm:$0xff] }
  0x3d   :  { %312 = vmatprep.subr.mxu0 %v886_v55  ;;  %383 = vmatprep.subr.mxu1 %v888_v56  ;;  %v953_v55 = vld [vmem:[%s1898_s0 + $0x460] sm:$0xff]  ;;  %v955_v56 = vld [vmem:[%s1898_s0 + $0x470] sm:$0xff] }
  0x3e   :  { %313 = vmatpush1.msra.mxu0 %v885_v57  ;;  %384 = vmatpush1.msra.mxu1 %v887_v58  ;;  %v950_v57 = vld [vmem:[%s1898_s0 + $0x448] sm:$0xff]  ;;  %v952_v58 = vld [vmem:[%s1898_s0 + $0x458] sm:$0xff] }
  0x3f   :  { %314 = vmatprep.subr.mxu0 %v882_v59  ;;  %385 = vmatprep.subr.mxu1 %v884_v60  ;;  %v949_v59 = vld [vmem:[%s1898_s0 + $0x440] sm:$0xff]  ;;  %v951_v60 = vld [vmem:[%s1898_s0 + $0x450] sm:$0xff] }
  0x40   :  { %315 = vmatpush1.msra.mxu0 %v881_v61  ;;  %386 = vmatpush1.msra.mxu1 %v883_v62  ;;  %v946_v61 = vld [vmem:[%s1898_s0 + $0x428] sm:$0xff]  ;;  %v948_v62 = vld [vmem:[%s1898_s0 + $0x438] sm:$0xff] }
  0x41   :  { %316 = vmatprep.subr.mxu0 %v878_v63  ;;  %387 = vmatprep.subr.mxu1 %v880_v0  ;;  %v945_v63 = vld [vmem:[%s1898_s0 + $0x420] sm:$0xff]  ;;  %v947_v0 = vld [vmem:[%s1898_s0 + $0x430] sm:$0xff] }
  0x42   :  { %317 = vmatpush1.msra.mxu0 %v877_v2  ;;  %350 = vmatprep.mubr.f32.mxu0 %v1072_v3  ;;  %v942_v2 = vld [vmem:[%s1898_s0 + $0x408] sm:$0xff] }
  0x43   :  { %388 = vmatpush1.msra.mxu1 %v879_v4  ;;  %421 = vmatprep.mubr.f32.mxu1 %v1072_v3  ;;  %v944_v4 = vld [vmem:[%s1898_s0 + $0x418] sm:$0xff] }
  0x44   :  { %351 = vmatmul.mubr.f32.vlgmr.msra.gmra.mxu0 %v1291_v1  ;;  %422 = vmatmul.mubr.f32.vlgmr.msra.gmra.mxu1 %v1291_v1 }
  0x45   :  { %497 = vmatprep.subr.mxu0 %v1002_v5  ;;  %568 = vmatprep.subr.mxu1 %v1004_v6  ;;  %v941_v5 = vld [vmem:[%s1898_s0 + $0x400] sm:$0xff]  ;;  %v943_v6 = vld [vmem:[%s1898_s0 + $0x410] sm:$0xff] }
  0x46   :  { %498 = vmatpush1.msra.mxu0 %v1001_v7  ;;  %569 = vmatpush1.msra.mxu1 %v1003_v8  ;;  %v1066_v7 = vld [vmem:[%s1898_s0 + $0x7e8] sm:$0xff]  ;;  %v1068_v8 = vld [vmem:[%s1898_s0 + $0x7f8] sm:$0xff] }
  0x47   :  { %499 = vmatprep.subr.mxu0 %v998_v9  ;;  %570 = vmatprep.subr.mxu1 %v1000_v10  ;;  %v1065_v9 = vld [vmem:[%s1898_s0 + $0x7e0] sm:$0xff]  ;;  %v1067_v10 = vld [vmem:[%s1898_s0 + $0x7f0] sm:$0xff] }
  0x48   :  { %500 = vmatpush1.msra.mxu0 %v997_v11  ;;  %571 = vmatpush1.msra.mxu1 %v999_v12  ;;  %v1062_v11 = vld [vmem:[%s1898_s0 + $0x7c8] sm:$0xff]  ;;  %v1064_v12 = vld [vmem:[%s1898_s0 + $0x7d8] sm:$0xff] }
  0x49   :  { %501 = vmatprep.subr.mxu0 %v994_v13  ;;  %572 = vmatprep.subr.mxu1 %v996_v14  ;;  %v1061_v13 = vld [vmem:[%s1898_s0 + $0x7c0] sm:$0xff]  ;;  %v1063_v14 = vld [vmem:[%s1898_s0 + $0x7d0] sm:$0xff] }
  0x4a   :  { %502 = vmatpush1.msra.mxu0 %v993_v15  ;;  %573 = vmatpush1.msra.mxu1 %v995_v16  ;;  %v1058_v15 = vld [vmem:[%s1898_s0 + $0x7a8] sm:$0xff]  ;;  %v1060_v16 = vld [vmem:[%s1898_s0 + $0x7b8] sm:$0xff] }
  0x4b   :  { %503 = vmatprep.subr.mxu0 %v990_v17  ;;  %574 = vmatprep.subr.mxu1 %v992_v18  ;;  %v1057_v17 = vld [vmem:[%s1898_s0 + $0x7a0] sm:$0xff]  ;;  %v1059_v18 = vld [vmem:[%s1898_s0 + $0x7b0] sm:$0xff] }
  0x4c   :  { %504 = vmatpush1.msra.mxu0 %v989_v19  ;;  %575 = vmatpush1.msra.mxu1 %v991_v20  ;;  %v1054_v19 = vld [vmem:[%s1898_s0 + $0x788] sm:$0xff]  ;;  %v1056_v20 = vld [vmem:[%s1898_s0 + $0x798] sm:$0xff] }
  0x4d   :  { %505 = vmatprep.subr.mxu0 %v986_v21  ;;  %576 = vmatprep.subr.mxu1 %v988_v22  ;;  %v1053_v21 = vld [vmem:[%s1898_s0 + $0x780] sm:$0xff]  ;;  %v1055_v22 = vld [vmem:[%s1898_s0 + $0x790] sm:$0xff] }
  0x4e   :  { %506 = vmatpush1.msra.mxu0 %v985_v23  ;;  %577 = vmatpush1.msra.mxu1 %v987_v24  ;;  %v1050_v23 = vld [vmem:[%s1898_s0 + $0x768] sm:$0xff]  ;;  %v1052_v24 = vld [vmem:[%s1898_s0 + $0x778] sm:$0xff] }
  0x4f   :  { %507 = vmatprep.subr.mxu0 %v982_v25  ;;  %578 = vmatprep.subr.mxu1 %v984_v26  ;;  %v1049_v25 = vld [vmem:[%s1898_s0 + $0x760] sm:$0xff]  ;;  %v1051_v26 = vld [vmem:[%s1898_s0 + $0x770] sm:$0xff] }
  0x50   :  { %508 = vmatpush1.msra.mxu0 %v981_v27  ;;  %579 = vmatpush1.msra.mxu1 %v983_v28  ;;  %v1046_v27 = vld [vmem:[%s1898_s0 + $0x748] sm:$0xff]  ;;  %v1048_v28 = vld [vmem:[%s1898_s0 + $0x758] sm:$0xff] }
  0x51   :  { %509 = vmatprep.subr.mxu0 %v978_v29  ;;  %580 = vmatprep.subr.mxu1 %v980_v30  ;;  %v1045_v29 = vld [vmem:[%s1898_s0 + $0x740] sm:$0xff]  ;;  %v1047_v30 = vld [vmem:[%s1898_s0 + $0x750] sm:$0xff] }
  0x52   :  { %510 = vmatpush1.msra.mxu0 %v977_v31  ;;  %581 = vmatpush1.msra.mxu1 %v979_v32  ;;  %v1042_v31 = vld [vmem:[%s1898_s0 + $0x728] sm:$0xff]  ;;  %v1044_v32 = vld [vmem:[%s1898_s0 + $0x738] sm:$0xff] }
  0x53   :  { %511 = vmatprep.subr.mxu0 %v974_v33  ;;  %582 = vmatprep.subr.mxu1 %v976_v34  ;;  %v1041_v33 = vld [vmem:[%s1898_s0 + $0x720] sm:$0xff]  ;;  %v1043_v34 = vld [vmem:[%s1898_s0 + $0x730] sm:$0xff] }
  0x54   :  { %512 = vmatpush1.msra.mxu0 %v973_v35  ;;  %583 = vmatpush1.msra.mxu1 %v975_v36  ;;  %v1038_v35 = vld [vmem:[%s1898_s0 + $0x708] sm:$0xff]  ;;  %v1040_v36 = vld [vmem:[%s1898_s0 + $0x718] sm:$0xff] }
  0x55   :  { %513 = vmatprep.subr.mxu0 %v970_v37  ;;  %584 = vmatprep.subr.mxu1 %v972_v38  ;;  %v1037_v37 = vld [vmem:[%s1898_s0 + $0x700] sm:$0xff]  ;;  %v1039_v38 = vld [vmem:[%s1898_s0 + $0x710] sm:$0xff] }
  0x56   :  { %514 = vmatpush1.msra.mxu0 %v969_v39  ;;  %585 = vmatpush1.msra.mxu1 %v971_v40  ;;  %v1034_v39 = vld [vmem:[%s1898_s0 + $0x6e8] sm:$0xff]  ;;  %v1036_v40 = vld [vmem:[%s1898_s0 + $0x6f8] sm:$0xff] }
  0x57   :  { %515 = vmatprep.subr.mxu0 %v966_v41  ;;  %586 = vmatprep.subr.mxu1 %v968_v42  ;;  %v1033_v41 = vld [vmem:[%s1898_s0 + $0x6e0] sm:$0xff]  ;;  %v1035_v42 = vld [vmem:[%s1898_s0 + $0x6f0] sm:$0xff] }
  0x58   :  { %516 = vmatpush1.msra.mxu0 %v965_v43  ;;  %587 = vmatpush1.msra.mxu1 %v967_v44  ;;  %v1030_v43 = vld [vmem:[%s1898_s0 + $0x6c8] sm:$0xff]  ;;  %v1032_v44 = vld [vmem:[%s1898_s0 + $0x6d8] sm:$0xff] }
  0x59   :  { %517 = vmatprep.subr.mxu0 %v962_v45  ;;  %588 = vmatprep.subr.mxu1 %v964_v46  ;;  %v1029_v45 = vld [vmem:[%s1898_s0 + $0x6c0] sm:$0xff]  ;;  %v1031_v46 = vld [vmem:[%s1898_s0 + $0x6d0] sm:$0xff] }
  0x5a   :  { %518 = vmatpush1.msra.mxu0 %v961_v47  ;;  %589 = vmatpush1.msra.mxu1 %v963_v48  ;;  %v1026_v47 = vld [vmem:[%s1898_s0 + $0x6a8] sm:$0xff]  ;;  %v1028_v48 = vld [vmem:[%s1898_s0 + $0x6b8] sm:$0xff] }
  0x5b   :  { %519 = vmatprep.subr.mxu0 %v958_v49  ;;  %590 = vmatprep.subr.mxu1 %v960_v50  ;;  %v1025_v49 = vld [vmem:[%s1898_s0 + $0x6a0] sm:$0xff]  ;;  %v1027_v50 = vld [vmem:[%s1898_s0 + $0x6b0] sm:$0xff] }
  0x5c   :  { %520 = vmatpush1.msra.mxu0 %v957_v51  ;;  %591 = vmatpush1.msra.mxu1 %v959_v52  ;;  %v1022_v51 = vld [vmem:[%s1898_s0 + $0x688] sm:$0xff]  ;;  %v1024_v52 = vld [vmem:[%s1898_s0 + $0x698] sm:$0xff] }
  0x5d   :  { %521 = vmatprep.subr.mxu0 %v954_v53  ;;  %592 = vmatprep.subr.mxu1 %v956_v54  ;;  %v1021_v53 = vld [vmem:[%s1898_s0 + $0x680] sm:$0xff]  ;;  %v1023_v54 = vld [vmem:[%s1898_s0 + $0x690] sm:$0xff] }
  0x5e   :  { %522 = vmatpush1.msra.mxu0 %v953_v55  ;;  %593 = vmatpush1.msra.mxu1 %v955_v56  ;;  %v1018_v55 = vld [vmem:[%s1898_s0 + $0x668] sm:$0xff]  ;;  %v1020_v56 = vld [vmem:[%s1898_s0 + $0x678] sm:$0xff] }
  0x5f   :  { %523 = vmatprep.subr.mxu0 %v950_v57  ;;  %594 = vmatprep.subr.mxu1 %v952_v58  ;;  %v1017_v57 = vld [vmem:[%s1898_s0 + $0x660] sm:$0xff]  ;;  %v1019_v58 = vld [vmem:[%s1898_s0 + $0x670] sm:$0xff] }
  0x60   :  { %524 = vmatpush1.msra.mxu0 %v949_v59  ;;  %595 = vmatpush1.msra.mxu1 %v951_v60  ;;  %v1014_v59 = vld [vmem:[%s1898_s0 + $0x648] sm:$0xff]  ;;  %v1016_v60 = vld [vmem:[%s1898_s0 + $0x658] sm:$0xff] }
  0x61   :  { %525 = vmatprep.subr.mxu0 %v946_v61  ;;  %596 = vmatprep.subr.mxu1 %v948_v62  ;;  %v1013_v61 = vld [vmem:[%s1898_s0 + $0x640] sm:$0xff]  ;;  %v1015_v62 = vld [vmem:[%s1898_s0 + $0x650] sm:$0xff] }
  0x62   :  { %526 = vmatpush1.msra.mxu0 %v945_v63  ;;  %597 = vmatpush1.msra.mxu1 %v947_v0  ;;  %v1010_v63 = vld [vmem:[%s1898_s0 + $0x628] sm:$0xff]  ;;  %v1012_v0 = vld [vmem:[%s1898_s0 + $0x638] sm:$0xff] }
  0x63   :  { %527 = vmatprep.subr.mxu0 %v942_v2  ;;  %598 = vmatprep.subr.mxu1 %v944_v4  ;;  %v1009_v2 = vld [vmem:[%s1898_s0 + $0x620] sm:$0xff]  ;;  %v1011_v4 = vld [vmem:[%s1898_s0 + $0x630] sm:$0xff] }
  0x64   :  { %528 = vmatpush1.msra.mxu0 %v941_v5  ;;  %561 = vmatprep.mubr.f32.mxu0 %v1072_v3  ;;  %v1006_v5 = vld [vmem:[%s1898_s0 + $0x608] sm:$0xff] }
  0x65   :  { %599 = vmatpush1.msra.mxu1 %v943_v6  ;;  %632 = vmatprep.mubr.f32.mxu1 %v1072_v3  ;;  %v1008_v6 = vld [vmem:[%s1898_s0 + $0x618] sm:$0xff] }
  0x66   :  { %562 = vmatmul.mubr.f32.vlgmr.msra.gmra.mxu0 %v1291_v1  ;;  %633 = vmatmul.mubr.f32.vlgmr.msra.gmra.mxu1 %v1291_v1 }
  0x67   :  { %708 = vmatprep.subr.mxu0 %v1066_v7  ;;  %779 = vmatprep.subr.mxu1 %v1068_v8  ;;  %v1005_v7 = vld [vmem:[%s1898_s0 + $0x600] sm:$0xff]  ;;  %v1007_v8 = vld [vmem:[%s1898_s0 + $0x610] sm:$0xff] }
  0x68   :  { %709 = vmatpush1.msra.mxu0 %v1065_v9  ;;  %780 = vmatpush1.msra.mxu1 %v1067_v10  ;;  %v854_v9 = vld [vmem:[%s1900_s2] sm:$0xff]  ;;  %v1073_v10 = vmov 0  }
  0x69   :  { %710 = vmatprep.subr.mxu0 %v1062_v11  ;;  %781 = vmatprep.subr.mxu1 %v1064_v12 }
  0x6a   :  { %711 = vmatpush1.msra.mxu0 %v1061_v13  ;;  %782 = vmatpush1.msra.mxu1 %v1063_v14 }
  0x6b   :  { %712 = vmatprep.subr.mxu0 %v1058_v15  ;;  %783 = vmatprep.subr.mxu1 %v1060_v16 }
  0x6c   :  { %713 = vmatpush1.msra.mxu0 %v1057_v17  ;;  %784 = vmatpush1.msra.mxu1 %v1059_v18 }
  0x6d   :  { %714 = vmatprep.subr.mxu0 %v1054_v19  ;;  %785 = vmatprep.subr.mxu1 %v1056_v20 }
  0x6e   :  { %715 = vmatpush1.msra.mxu0 %v1053_v21  ;;  %786 = vmatpush1.msra.mxu1 %v1055_v22 }
  0x6f   :  { %716 = vmatprep.subr.mxu0 %v1050_v23  ;;  %787 = vmatprep.subr.mxu1 %v1052_v24 }
  0x70   :  { %717 = vmatpush1.msra.mxu0 %v1049_v25  ;;  %788 = vmatpush1.msra.mxu1 %v1051_v26 }
  0x71   :  { %718 = vmatprep.subr.mxu0 %v1046_v27  ;;  %789 = vmatprep.subr.mxu1 %v1048_v28 }
  0x72   :  { %719 = vmatpush1.msra.mxu0 %v1045_v29  ;;  %790 = vmatpush1.msra.mxu1 %v1047_v30 }
  0x73   :  { %720 = vmatprep.subr.mxu0 %v1042_v31  ;;  %791 = vmatprep.subr.mxu1 %v1044_v32 }
  0x74   :  { %721 = vmatpush1.msra.mxu0 %v1041_v33  ;;  %792 = vmatpush1.msra.mxu1 %v1043_v34 }
  0x75   :  { %722 = vmatprep.subr.mxu0 %v1038_v35  ;;  %793 = vmatprep.subr.mxu1 %v1040_v36 }
  0x76   :  { %723 = vmatpush1.msra.mxu0 %v1037_v37  ;;  %794 = vmatpush1.msra.mxu1 %v1039_v38 }
  0x77   :  { %724 = vmatprep.subr.mxu0 %v1034_v39  ;;  %795 = vmatprep.subr.mxu1 %v1036_v40 }
  0x78   :  { %725 = vmatpush1.msra.mxu0 %v1033_v41  ;;  %796 = vmatpush1.msra.mxu1 %v1035_v42 }
  0x79   :  { %726 = vmatprep.subr.mxu0 %v1030_v43  ;;  %797 = vmatprep.subr.mxu1 %v1032_v44 }
  0x7a   :  { %727 = vmatpush1.msra.mxu0 %v1029_v45  ;;  %798 = vmatpush1.msra.mxu1 %v1031_v46 }
  0x7b   :  { %728 = vmatprep.subr.mxu0 %v1026_v47  ;;  %799 = vmatprep.subr.mxu1 %v1028_v48 }
  0x7c   :  { %729 = vmatpush1.msra.mxu0 %v1025_v49  ;;  %800 = vmatpush1.msra.mxu1 %v1027_v50 }
  0x7d   :  { %730 = vmatprep.subr.mxu0 %v1022_v51  ;;  %801 = vmatprep.subr.mxu1 %v1024_v52 }
  0x7e   :  { %731 = vmatpush1.msra.mxu0 %v1021_v53  ;;  %802 = vmatpush1.msra.mxu1 %v1023_v54 }
  0x7f   :  { %732 = vmatprep.subr.mxu0 %v1018_v55  ;;  %803 = vmatprep.subr.mxu1 %v1020_v56 }
  0x80   :  { %733 = vmatpush1.msra.mxu0 %v1017_v57  ;;  %804 = vmatpush1.msra.mxu1 %v1019_v58 }
  0x81   :  { %734 = vmatprep.subr.mxu0 %v1014_v59  ;;  %805 = vmatprep.subr.mxu1 %v1016_v60 }
  0x82   :  { %735 = vmatpush1.msra.mxu0 %v1013_v61  ;;  %806 = vmatpush1.msra.mxu1 %v1015_v62 }
  0x83   :  { %736 = vmatprep.subr.mxu0 %v1010_v63  ;;  %807 = vmatprep.subr.mxu1 %v1012_v0 }
  0x84   :  { %737 = vmatpush1.msra.mxu0 %v1009_v2  ;;  %808 = vmatpush1.msra.mxu1 %v1011_v4 }
  0x85   :  { %738 = vmatprep.subr.mxu0 %v1006_v5  ;;  %809 = vmatprep.subr.mxu1 %v1008_v6 }
  0x86   :  { %739 = vmatpush1.msra.mxu0 %v1005_v7  ;;  %772 = vmatprep.mubr.f32.mxu0 %v1072_v3 }
  0x87   :  { %810 = vmatpush1.msra.mxu1 %v1007_v8  ;;  %843 = vmatprep.mubr.f32.mxu1 %v1072_v3 }
  0x88   :  { %773 = vmatmul.mubr.f32.vlgmr.msra.gmra.mxu0 %v1291_v1  ;;  %844 = vmatmul.mubr.f32.vlgmr.msra.gmra.mxu1 %v1291_v1 }
  0x89   :  { %1071 = vset.pattern.permute.xlu0 %v1073_v10 }
  0x8a   :  { %857 = vperm.xlu0 %1071, %v854_v9  }
  0xe2   :  { %v145_v11 = vpop.f32.mrf.mxu0  ;;  %v216_v12 = vpop.f32.mrf.mxu1 }
  0xe4   :  { %v147_v13 = vpop.f32.mrf.mxu0  ;;  %v218_v14 = vpop.f32.mrf.mxu1 }
 0x104   :  { %v352_v15 = vpop.f32.mrf.mxu0  ;;  %v423_v16 = vpop.f32.mrf.mxu1 }
 0x105   :  { %v428_v20 = vmax.f32 %v145_v11, %v352_v15  ;;  %v430_v21 = vmax.f32 %v216_v12, %v423_v16  ;;  %v858_v27 = vpop.permute.xlu0 %857 }
 0x106   :  { %v354_v17 = vpop.f32.mrf.mxu0  ;;  %v425_v18 = vpop.f32.mrf.mxu1 }
 0x107   :  { %v429_v24 = vmax.f32 %v147_v13, %v354_v17  ;;  %v431_v25 = vmax.f32 %v218_v14, %v425_v18 }
 0x126   :  { %v563_v3 = vpop.f32.mrf.mxu0  ;;  %v634_v19 = vpop.f32.mrf.mxu1 }
 0x127   :  { %v639_v1 = vmax.f32 %v428_v20, %v563_v3  ;;  %v641_v26 = vmax.f32 %v430_v21, %v634_v19 }
 0x128   :  { %v565_v22 = vpop.f32.mrf.mxu0  ;;  %v636_v23 = vpop.f32.mrf.mxu1 }
 0x129   :  { %v640_v30 = vmax.f32 %v429_v24, %v565_v22  ;;  %v642_v31 = vmax.f32 %v431_v25, %v636_v23 }
 0x148   :  { %v774_v28 = vpop.f32.mrf.mxu0  ;;  %v845_v29 = vpop.f32.mrf.mxu1 }
 0x149   :  { %v850_v32 = vmax.f32 %v639_v1, %v774_v28  ;;  %v852_v33 = vmax.f32 %v641_v26, %v845_v29 }
 0x14a   :  { %v776_v34 = vpop.f32.mrf.mxu0  ;;  %v847_v35 = vpop.f32.mrf.mxu1 }
 0x14b   :  { %v860_v36 = vadd.f32 %v858_v27, %v850_v32  ;;  %v862_v37 = vadd.f32 %v858_v27, %v852_v33  ;;  %v851_v38 = vmax.f32 %v640_v30, %v776_v34  ;;  %v853_v39 = vmax.f32 %v642_v31, %v847_v35 }
 0x14d   :  { %v864_v40 = vmax.f32 %v860_v36, 0.0  ;;  %v866_v41 = vmax.f32 %v862_v37, 0.0  ;;  %v861_v42 = vadd.f32 %v858_v27, %v851_v38  ;;  %v863_v43 = vadd.f32 %v858_v27, %v853_v39 }
 0x14f   :  { %868 = vst [vmem:[%s1901_s3] sm:$0xff] %v864_v40  ;;  %870 = vst [vmem:[%s1901_s3 + $0x10] sm:$0xff] %v866_v41  ;;  %v865_v44 = vmax.f32 %v861_v42, 0.0  ;;  %v867_v45 = vmax.f32 %v863_v43, 0.0 }
 0x151   :  { %869 = vst [vmem:[%s1901_s3 + $0x8] sm:$0xff] %v865_v44  ;;  %872 = vst.msk [vmem:[%s1901_s3 + $0x18] sm:$0xff] %vm871_vm0, %v867_v45 }

// kernel: lenet_forward.4
= control target key start
LH: loop header
LB: loop body
LE: loop exit
PB: predicated region body
PF: predicated region fallthrough
CT: control target
= control target key end

     0   :  { %v728_v3 = vmov 0   ;;  %vm471_vm0 = vcmask 801792   ;;  %s1169_s0 = inlined_call_operand.vmem [shape: f32[4,256,98], index: 0, kind: input, shape index: {}]   ;;  %s1170_s1 = inlined_call_operand.vmem [shape: f32[16,256], index: 1, kind: input, shape index: {}]   ;;  %s1171_s2 = inlined_call_operand.vmem [shape: f32[16,1], index: 2, kind: input, shape index: {}]   ;;  %s1172_s3 = inlined_call_operand.vmem [shape: f32[16,98], index: 3, kind: output, shape index: {}]  }
   0x1   :  { %v49_v0 = vld [vmem:[%s1169_s0 + $0xf8] sm:$0xff]  ;;  %727 = vset.pattern.permute.xlu0 %v728_v3  ;;  %v48_v5 = vld [vmem:[%s1169_s0 + $0xf0] sm:$0xff]  ;;  %v47_v9 = vld [vmem:[%s1169_s0 + $0xe8] sm:$0xff] }
   0x2   :  { %v509_v1 = vld [vmem:[%s1169_s0 + $0x1f8] sm:$0xff]  ;;  %574 = vmatprep.subr.mxu0 %v49_v0  ;;  %v508_v6 = vld [vmem:[%s1169_s0 + $0x1f0] sm:$0xff]  ;;  %v507_v10 = vld [vmem:[%s1169_s0 + $0x1e8] sm:$0xff] }
   0x3   :  { %v33_v2 = vld [vmem:[%s1169_s0 + $0x78] sm:$0xff]  ;;  %612 = vmatprep.subr.mxu1 %v509_v1  ;;  %v32_v7 = vld [vmem:[%s1169_s0 + $0x70] sm:$0xff]  ;;  %v31_v11 = vld [vmem:[%s1169_s0 + $0x68] sm:$0xff] }
   0x4   :  { %v493_v4 = vld [vmem:[%s1169_s0 + $0x178] sm:$0xff]  ;;  %575 = vmatpush3.msra.mxu0 %v33_v2  ;;  %v492_v8 = vld [vmem:[%s1169_s0 + $0x170] sm:$0xff]  ;;  %v491_v12 = vld [vmem:[%s1169_s0 + $0x168] sm:$0xff] }
   0x5   :  { %613 = vmatpush3.msra.mxu1 %v493_v4  ;;  %576 = vmatprep.subr.mxu0 %v48_v5  ;;  %v46_v13 = vld [vmem:[%s1169_s0 + $0xe0] sm:$0xff]  ;;  %v45_v17 = vld [vmem:[%s1169_s0 + $0xd8] sm:$0xff]  ;;  %v44_v21 = vld [vmem:[%s1169_s0 + $0xd0] sm:$0xff] }
   0x6   :  { %614 = vmatprep.subr.mxu1 %v508_v6  ;;  %577 = vmatpush3.msra.mxu0 %v32_v7  ;;  %v506_v14 = vld [vmem:[%s1169_s0 + $0x1e0] sm:$0xff]  ;;  %v505_v18 = vld [vmem:[%s1169_s0 + $0x1d8] sm:$0xff]  ;;  %v504_v22 = vld [vmem:[%s1169_s0 + $0x1d0] sm:$0xff] }
   0x7   :  { %615 = vmatpush3.msra.mxu1 %v492_v8  ;;  %578 = vmatprep.subr.mxu0 %v47_v9  ;;  %v30_v15 = vld [vmem:[%s1169_s0 + $0x60] sm:$0xff]  ;;  %v29_v19 = vld [vmem:[%s1169_s0 + $0x58] sm:$0xff]  ;;  %v28_v23 = vld [vmem:[%s1169_s0 + $0x50] sm:$0xff] }
   0x8   :  { %616 = vmatprep.subr.mxu1 %v507_v10  ;;  %v490_v16 = vld [vmem:[%s1169_s0 + $0x160] sm:$0xff]  ;;  %579 = vmatpush3.msra.mxu0 %v31_v11  ;;  %v489_v20 = vld [vmem:[%s1169_s0 + $0x158] sm:$0xff]  ;;  %v488_v24 = vld [vmem:[%s1169_s0 + $0x150] sm:$0xff] }
   0x9   :  { %617 = vmatpush3.msra.mxu1 %v491_v12  ;;  %580 = vmatprep.subr.mxu0 %v46_v13  ;;  %v43_v25 = vld [vmem:[%s1169_s0 + $0xc8] sm:$0xff]  ;;  %v42_v29 = vld [vmem:[%s1169_s0 + $0xc0] sm:$0xff]  ;;  %v41_v33 = vld [vmem:[%s1169_s0 + $0xb8] sm:$0xff] }
   0xa   :  { %618 = vmatprep.subr.mxu1 %v506_v14  ;;  %581 = vmatpush3.msra.mxu0 %v30_v15  ;;  %v503_v26 = vld [vmem:[%s1169_s0 + $0x1c8] sm:$0xff]  ;;  %v502_v30 = vld [vmem:[%s1169_s0 + $0x1c0] sm:$0xff]  ;;  %v501_v34 = vld [vmem:[%s1169_s0 + $0x1b8] sm:$0xff] }
   0xb   :  { %619 = vmatpush3.msra.mxu1 %v490_v16  ;;  %582 = vmatprep.subr.mxu0 %v45_v17  ;;  %v27_v27 = vld [vmem:[%s1169_s0 + $0x48] sm:$0xff]  ;;  %v26_v31 = vld [vmem:[%s1169_s0 + $0x40] sm:$0xff]  ;;  %v25_v35 = vld [vmem:[%s1169_s0 + $0x38] sm:$0xff] }
   0xc   :  { %620 = vmatprep.subr.mxu1 %v505_v18  ;;  %583 = vmatpush3.msra.mxu0 %v29_v19  ;;  %v487_v28 = vld [vmem:[%s1169_s0 + $0x148] sm:$0xff]  ;;  %v486_v32 = vld [vmem:[%s1169_s0 + $0x140] sm:$0xff]  ;;  %v485_v36 = vld [vmem:[%s1169_s0 + $0x138] sm:$0xff] }
   0xd   :  { %621 = vmatpush3.msra.mxu1 %v489_v20  ;;  %584 = vmatprep.subr.mxu0 %v44_v21  ;;  %v40_v37 = vld [vmem:[%s1169_s0 + $0xb0] sm:$0xff]  ;;  %v39_v41 = vld [vmem:[%s1169_s0 + $0xa8] sm:$0xff]  ;;  %v38_v45 = vld [vmem:[%s1169_s0 + $0xa0] sm:$0xff] }
   0xe   :  { %622 = vmatprep.subr.mxu1 %v504_v22  ;;  %585 = vmatpush3.msra.mxu0 %v28_v23  ;;  %v500_v38 = vld [vmem:[%s1169_s0 + $0x1b0] sm:$0xff]  ;;  %v499_v42 = vld [vmem:[%s1169_s0 + $0x1a8] sm:$0xff]  ;;  %v498_v46 = vld [vmem:[%s1169_s0 + $0x1a0] sm:$0xff] }
   0xf   :  { %623 = vmatpush3.msra.mxu1 %v488_v24  ;;  %586 = vmatprep.subr.mxu0 %v43_v25  ;;  %v24_v39 = vld [vmem:[%s1169_s0 + $0x30] sm:$0xff]  ;;  %v23_v43 = vld [vmem:[%s1169_s0 + $0x28] sm:$0xff]  ;;  %v22_v47 = vld [vmem:[%s1169_s0 + $0x20] sm:$0xff] }
  0x10   :  { %624 = vmatprep.subr.mxu1 %v503_v26  ;;  %587 = vmatpush3.msra.mxu0 %v27_v27  ;;  %v484_v40 = vld [vmem:[%s1169_s0 + $0x130] sm:$0xff]  ;;  %v483_v44 = vld [vmem:[%s1169_s0 + $0x128] sm:$0xff]  ;;  %v482_v48 = vld [vmem:[%s1169_s0 + $0x120] sm:$0xff] }
  0x11   :  { %625 = vmatpush3.msra.mxu1 %v487_v28  ;;  %588 = vmatprep.subr.mxu0 %v42_v29  ;;  %v37_v49 = vld [vmem:[%s1169_s0 + $0x98] sm:$0xff]  ;;  %v36_v53 = vld [vmem:[%s1169_s0 + $0x90] sm:$0xff]  ;;  %v35_v57 = vld [vmem:[%s1169_s0 + $0x88] sm:$0xff] }
  0x12   :  { %626 = vmatprep.subr.mxu1 %v502_v30  ;;  %589 = vmatpush3.msra.mxu0 %v26_v31  ;;  %v497_v50 = vld [vmem:[%s1169_s0 + $0x198] sm:$0xff]  ;;  %v496_v54 = vld [vmem:[%s1169_s0 + $0x190] sm:$0xff]  ;;  %v495_v58 = vld [vmem:[%s1169_s0 + $0x188] sm:$0xff] }
  0x13   :  { %627 = vmatpush3.msra.mxu1 %v486_v32  ;;  %590 = vmatprep.subr.mxu0 %v41_v33  ;;  %v21_v51 = vld [vmem:[%s1169_s0 + $0x18] sm:$0xff]  ;;  %v20_v55 = vld [vmem:[%s1169_s0 + $0x10] sm:$0xff]  ;;  %v19_v59 = vld [vmem:[%s1169_s0 + $0x8] sm:$0xff] }
  0x14   :  { %628 = vmatprep.subr.mxu1 %v501_v34  ;;  %591 = vmatpush3.msra.mxu0 %v25_v35  ;;  %v481_v52 = vld [vmem:[%s1169_s0 + $0x118] sm:$0xff]  ;;  %v480_v56 = vld [vmem:[%s1169_s0 + $0x110] sm:$0xff]  ;;  %v479_v60 = vld [vmem:[%s1169_s0 + $0x108] sm:$0xff] }
  0x15   :  { %629 = vmatpush3.msra.mxu1 %v485_v36  ;;  %592 = vmatprep.subr.mxu0 %v40_v37  ;;  %v34_v61 = vld [vmem:[%s1169_s0 + $0x80] sm:$0xff]  ;;  %v941_v0 = vld [vmem:[%s1170_s1 + $0x8] sm:$0xff]  ;;  %v541_v3 = vld [vmem:[%s1169_s0 + $0x2f8] sm:$0xff] }
  0x16   :  { %630 = vmatprep.subr.mxu1 %v500_v38  ;;  %593 = vmatpush3.msra.mxu0 %v24_v39  ;;  %v494_v62 = vld [vmem:[%s1169_s0 + $0x180] sm:$0xff]  ;;  %v573_v4 = vld [vmem:[%s1169_s0 + $0x3f8] sm:$0xff]  ;;  %v540_v7 = vld [vmem:[%s1169_s0 + $0x2f0] sm:$0xff] }
  0x17   :  { %631 = vmatpush3.msra.mxu1 %v484_v40  ;;  %594 = vmatprep.subr.mxu0 %v39_v41  ;;  %v18_v63 = vld [vmem:[%s1169_s0] sm:$0xff]  ;;  %v525_v5 = vld [vmem:[%s1169_s0 + $0x278] sm:$0xff]  ;;  %v572_v8 = vld [vmem:[%s1169_s0 + $0x3f0] sm:$0xff] }
  0x18   :  { %632 = vmatprep.subr.mxu1 %v499_v42  ;;  %595 = vmatpush3.msra.mxu0 %v23_v43  ;;  %v478_v1 = vld [vmem:[%s1169_s0 + $0x100] sm:$0xff]  ;;  %v557_v6 = vld [vmem:[%s1169_s0 + $0x378] sm:$0xff]  ;;  %v524_v9 = vld [vmem:[%s1169_s0 + $0x270] sm:$0xff] }
  0x19   :  { %633 = vmatpush3.msra.mxu1 %v483_v44  ;;  %596 = vmatprep.subr.mxu0 %v38_v45  ;;  %v949_v2 = vld [vmem:[%s1170_s1] sm:$0xff]  ;;  %v556_v10 = vld [vmem:[%s1169_s0 + $0x370] sm:$0xff]  ;;  %v539_v11 = vld [vmem:[%s1169_s0 + $0x2e8] sm:$0xff] }
  0x1a   :  { %634 = vmatprep.subr.mxu1 %v498_v46  ;;  %597 = vmatpush3.msra.mxu0 %v22_v47  ;;  %v571_v12 = vld [vmem:[%s1169_s0 + $0x3e8] sm:$0xff]  ;;  %v538_v15 = vld [vmem:[%s1169_s0 + $0x2e0] sm:$0xff]  ;;  %v537_v19 = vld [vmem:[%s1169_s0 + $0x2d8] sm:$0xff] }
  0x1b   :  { %635 = vmatpush3.msra.mxu1 %v482_v48  ;;  %598 = vmatprep.subr.mxu0 %v37_v49  ;;  %v523_v13 = vld [vmem:[%s1169_s0 + $0x268] sm:$0xff]  ;;  %v570_v16 = vld [vmem:[%s1169_s0 + $0x3e0] sm:$0xff]  ;;  %v569_v20 = vld [vmem:[%s1169_s0 + $0x3d8] sm:$0xff] }
  0x1c   :  { %636 = vmatprep.subr.mxu1 %v497_v50  ;;  %599 = vmatpush3.msra.mxu0 %v21_v51  ;;  %v555_v14 = vld [vmem:[%s1169_s0 + $0x368] sm:$0xff]  ;;  %v522_v17 = vld [vmem:[%s1169_s0 + $0x260] sm:$0xff]  ;;  %v521_v21 = vld [vmem:[%s1169_s0 + $0x258] sm:$0xff] }
  0x1d   :  { %637 = vmatpush3.msra.mxu1 %v481_v52  ;;  %600 = vmatprep.subr.mxu0 %v36_v53  ;;  %v554_v18 = vld [vmem:[%s1169_s0 + $0x360] sm:$0xff]  ;;  %v553_v22 = vld [vmem:[%s1169_s0 + $0x358] sm:$0xff]  ;;  %v536_v23 = vld [vmem:[%s1169_s0 + $0x2d0] sm:$0xff] }
  0x1e   :  { %638 = vmatprep.subr.mxu1 %v496_v54  ;;  %601 = vmatpush3.msra.mxu0 %v20_v55  ;;  %v568_v24 = vld [vmem:[%s1169_s0 + $0x3d0] sm:$0xff]  ;;  %v535_v27 = vld [vmem:[%s1169_s0 + $0x2c8] sm:$0xff]  ;;  %v534_v31 = vld [vmem:[%s1169_s0 + $0x2c0] sm:$0xff] }
  0x1f   :  { %639 = vmatpush3.msra.mxu1 %v480_v56  ;;  %602 = vmatprep.subr.mxu0 %v35_v57  ;;  %v520_v25 = vld [vmem:[%s1169_s0 + $0x250] sm:$0xff]  ;;  %v567_v28 = vld [vmem:[%s1169_s0 + $0x3c8] sm:$0xff]  ;;  %v566_v32 = vld [vmem:[%s1169_s0 + $0x3c0] sm:$0xff] }
  0x20   :  { %640 = vmatprep.subr.mxu1 %v495_v58  ;;  %603 = vmatpush3.msra.mxu0 %v19_v59  ;;  %v552_v26 = vld [vmem:[%s1169_s0 + $0x350] sm:$0xff]  ;;  %v519_v29 = vld [vmem:[%s1169_s0 + $0x248] sm:$0xff]  ;;  %v518_v33 = vld [vmem:[%s1169_s0 + $0x240] sm:$0xff] }
  0x21   :  { %641 = vmatpush3.msra.mxu1 %v479_v60  ;;  %604 = vmatprep.subr.mxu0 %v34_v61  ;;  %v551_v30 = vld [vmem:[%s1169_s0 + $0x348] sm:$0xff]  ;;  %v550_v34 = vld [vmem:[%s1169_s0 + $0x340] sm:$0xff]  ;;  %v533_v35 = vld [vmem:[%s1169_s0 + $0x2b8] sm:$0xff] }
  0x22   :  { %642 = vmatprep.subr.mxu1 %v494_v62  ;;  %605 = vmatpush3.msra.mxu0 %v18_v63  ;;  %v565_v36 = vld [vmem:[%s1169_s0 + $0x3b8] sm:$0xff]  ;;  %v532_v39 = vld [vmem:[%s1169_s0 + $0x2b0] sm:$0xff]  ;;  %v531_v43 = vld [vmem:[%s1169_s0 + $0x2a8] sm:$0xff] }
  0x23   :  { %114 = vmatprep.mubr.f32.mxu0 %v941_v0  ;;  %643 = vmatpush3.msra.mxu1 %v478_v1  ;;  %v517_v37 = vld [vmem:[%s1169_s0 + $0x238] sm:$0xff]  ;;  %v564_v40 = vld [vmem:[%s1169_s0 + $0x3b0] sm:$0xff]  ;;  %v563_v44 = vld [vmem:[%s1169_s0 + $0x3a8] sm:$0xff] }
  0x24   :  { %222 = vmatprep.mubr.f32.mxu1 %v941_v0  ;;  %115 = vmatmul.mubr.f32.vlgmr.msra.gmra.mxu0 %v949_v2  ;;  %v549_v38 = vld [vmem:[%s1169_s0 + $0x338] sm:$0xff]  ;;  %v516_v41 = vld [vmem:[%s1169_s0 + $0x230] sm:$0xff]  ;;  %v515_v45 = vld [vmem:[%s1169_s0 + $0x228] sm:$0xff] }
  0x25   :  { %223 = vmatmul.mubr.f32.vlgmr.msra.gmra.mxu1 %v949_v2  ;;  %650 = vmatprep.subr.mxu0 %v541_v3  ;;  %v548_v42 = vld [vmem:[%s1169_s0 + $0x330] sm:$0xff]  ;;  %v547_v46 = vld [vmem:[%s1169_s0 + $0x328] sm:$0xff]  ;;  %v530_v47 = vld [vmem:[%s1169_s0 + $0x2a0] sm:$0xff] }
  0x26   :  { %688 = vmatprep.subr.mxu1 %v573_v4  ;;  %651 = vmatpush3.msra.mxu0 %v525_v5  ;;  %v562_v48 = vld [vmem:[%s1169_s0 + $0x3a0] sm:$0xff]  ;;  %v529_v51 = vld [vmem:[%s1169_s0 + $0x298] sm:$0xff]  ;;  %v16_v56 = vld [vmem:[%s1170_s1 + $0x10] sm:$0xff] }
  0x27   :  { %689 = vmatpush3.msra.mxu1 %v557_v6  ;;  %652 = vmatprep.subr.mxu0 %v540_v7  ;;  %v514_v49 = vld [vmem:[%s1169_s0 + $0x220] sm:$0xff]  ;;  %v561_v52 = vld [vmem:[%s1169_s0 + $0x398] sm:$0xff]  ;;  %v528_v57 = vld [vmem:[%s1169_s0 + $0x290] sm:$0xff] }
  0x28   :  { %690 = vmatprep.subr.mxu1 %v572_v8  ;;  %653 = vmatpush3.msra.mxu0 %v524_v9  ;;  %v546_v50 = vld [vmem:[%s1169_s0 + $0x320] sm:$0xff]  ;;  %v17_v53 = vld [vmem:[%s1170_s1 + $0x18] sm:$0xff]  ;;  %v560_v58 = vld [vmem:[%s1169_s0 + $0x390] sm:$0xff] }
  0x29   :  { %691 = vmatpush3.msra.mxu1 %v556_v10  ;;  %654 = vmatprep.subr.mxu0 %v539_v11  ;;  %v513_v54 = vld [vmem:[%s1169_s0 + $0x218] sm:$0xff]  ;;  %v512_v59 = vld [vmem:[%s1169_s0 + $0x210] sm:$0xff]  ;;  %v527_v61 = vld [vmem:[%s1169_s0 + $0x288] sm:$0xff] }
  0x2a   :  { %692 = vmatprep.subr.mxu1 %v571_v12  ;;  %655 = vmatpush3.msra.mxu0 %v523_v13  ;;  %v545_v55 = vld [vmem:[%s1169_s0 + $0x318] sm:$0xff]  ;;  %v544_v60 = vld [vmem:[%s1169_s0 + $0x310] sm:$0xff]  ;;  %v559_v62 = vld [vmem:[%s1169_s0 + $0x388] sm:$0xff] }
  0x2b   :  { %693 = vmatpush3.msra.mxu1 %v555_v14  ;;  %656 = vmatprep.subr.mxu0 %v538_v15  ;;  %v511_v63 = vld [vmem:[%s1169_s0 + $0x208] sm:$0xff]  ;;  %v526_v3 = vld [vmem:[%s1169_s0 + $0x280] sm:$0xff] }
  0x2c   :  { %694 = vmatprep.subr.mxu1 %v570_v16  ;;  %657 = vmatpush3.msra.mxu0 %v522_v17  ;;  %v543_v1 = vld [vmem:[%s1169_s0 + $0x308] sm:$0xff]  ;;  %v558_v4 = vld [vmem:[%s1169_s0 + $0x380] sm:$0xff] }
  0x2d   :  { %695 = vmatpush3.msra.mxu1 %v554_v18  ;;  %658 = vmatprep.subr.mxu0 %v537_v19  ;;  %v510_v5 = vld [vmem:[%s1169_s0 + $0x200] sm:$0xff]  ;;  %v456_v8 = vld [vmem:[%s1171_s2 + $0x8] sm:$0xff] }
  0x2e   :  { %696 = vmatprep.subr.mxu1 %v569_v20  ;;  %659 = vmatpush3.msra.mxu0 %v521_v21  ;;  %v542_v6 = vld [vmem:[%s1169_s0 + $0x300] sm:$0xff] }
  0x2f   :  { %697 = vmatpush3.msra.mxu1 %v553_v22  ;;  %660 = vmatprep.subr.mxu0 %v536_v23  ;;  %v455_v7 = vld [vmem:[%s1171_s2] sm:$0xff] }
  0x30   :  { %698 = vmatprep.subr.mxu1 %v568_v24  ;;  %661 = vmatpush3.msra.mxu0 %v520_v25 }
  0x31   :  { %699 = vmatpush3.msra.mxu1 %v552_v26  ;;  %662 = vmatprep.subr.mxu0 %v535_v27 }
  0x32   :  { %700 = vmatprep.subr.mxu1 %v567_v28  ;;  %663 = vmatpush3.msra.mxu0 %v519_v29 }
  0x33   :  { %701 = vmatpush3.msra.mxu1 %v551_v30  ;;  %664 = vmatprep.subr.mxu0 %v534_v31 }
  0x34   :  { %702 = vmatprep.subr.mxu1 %v566_v32  ;;  %665 = vmatpush3.msra.mxu0 %v518_v33 }
  0x35   :  { %703 = vmatpush3.msra.mxu1 %v550_v34  ;;  %666 = vmatprep.subr.mxu0 %v533_v35 }
  0x36   :  { %704 = vmatprep.subr.mxu1 %v565_v36  ;;  %667 = vmatpush3.msra.mxu0 %v517_v37 }
  0x37   :  { %705 = vmatpush3.msra.mxu1 %v549_v38  ;;  %668 = vmatprep.subr.mxu0 %v532_v39 }
  0x38   :  { %706 = vmatprep.subr.mxu1 %v564_v40  ;;  %669 = vmatpush3.msra.mxu0 %v516_v41 }
  0x39   :  { %707 = vmatpush3.msra.mxu1 %v548_v42  ;;  %670 = vmatprep.subr.mxu0 %v531_v43 }
  0x3a   :  { %708 = vmatprep.subr.mxu1 %v563_v44  ;;  %671 = vmatpush3.msra.mxu0 %v515_v45 }
  0x3b   :  { %709 = vmatpush3.msra.mxu1 %v547_v46  ;;  %672 = vmatprep.subr.mxu0 %v530_v47 }
  0x3c   :  { %710 = vmatprep.subr.mxu1 %v562_v48  ;;  %673 = vmatpush3.msra.mxu0 %v514_v49 }
  0x3d   :  { %711 = vmatpush3.msra.mxu1 %v546_v50  ;;  %674 = vmatprep.subr.mxu0 %v529_v51 }
  0x3e   :  { %712 = vmatprep.subr.mxu1 %v561_v52  ;;  %119 = vmatprep.mubr.f32.mxu0 %v17_v53 }
  0x3f   :  { %227 = vmatprep.mubr.f32.mxu1 %v17_v53  ;;  %675 = vmatpush3.msra.mxu0 %v513_v54 }
  0x40   :  { %713 = vmatpush3.msra.mxu1 %v545_v55  ;;  %120 = vmatmul.mubr.f32.gmra.mxu0 %v16_v56 }
  0x41   :  { %228 = vmatmul.mubr.f32.gmra.mxu1 %v16_v56  ;;  %676 = vmatprep.subr.mxu0 %v528_v57 }
  0x42   :  { %714 = vmatprep.subr.mxu1 %v560_v58  ;;  %677 = vmatpush3.msra.mxu0 %v512_v59 }
  0x43   :  { %715 = vmatpush3.msra.mxu1 %v544_v60  ;;  %678 = vmatprep.subr.mxu0 %v527_v61 }
  0x44   :  { %716 = vmatprep.subr.mxu1 %v559_v62  ;;  %679 = vmatpush3.msra.mxu0 %v511_v63 }
  0x45   :  { %717 = vmatpush3.msra.mxu1 %v543_v1  ;;  %680 = vmatprep.subr.mxu0 %v526_v3 }
  0x46   :  { %718 = vmatprep.subr.mxu1 %v558_v4  ;;  %681 = vmatpush3.msra.mxu0 %v510_v5 }
  0x47   :  { %332 = vmatprep.mubr.f32.mxu0 %v941_v0  ;;  %719 = vmatpush3.msra.mxu1 %v542_v6 }
  0x48   :  { %442 = vmatprep.mubr.f32.mxu1 %v941_v0  ;;  %333 = vmatmul.mubr.f32.vlgmr.msra.gmra.mxu0 %v949_v2 }
  0x49   :  { %443 = vmatmul.mubr.f32.vlgmr.msra.gmra.mxu1 %v949_v2  ;;  %337 = vmatprep.mubr.f32.mxu0 %v17_v53 }
  0x4a   :  { %447 = vmatprep.mubr.f32.mxu1 %v17_v53  ;;  %459 = vperm.xlu0 %727, %v455_v7  }
  0x4c   :  { %338 = vmatmul.mubr.f32.gmra.mxu0 %v16_v56 }
  0x4d   :  { %448 = vmatmul.mubr.f32.gmra.mxu1 %v16_v56 }
  0x4e   :  { %464 = vperm.xlu0 %727, %v456_v8  }
  0xc5   :  { %v460_v29 = vpop.permute.xlu0 %459 }
  0xc9   :  { %v465_v40 = vpop.permute.xlu0 %464 }
  0xe4   :  { %v606_v9 = vpop.f32.mrf.mxu0 }
  0xe5   :  { %v644_v0 = vpop.f32.mrf.mxu1 }
  0xe6   :  { %v607_v10 = vpop.f32.mrf.mxu0 }
  0xe7   :  { %v645_v11 = vpop.f32.mrf.mxu1  ;;  %v608_v16 = vadd.f32 %v607_v10, %v606_v9 }
  0xe8   :  { %v646_v2 = vadd.f32 %v645_v11, %v644_v0 }
  0xea   :  { %v233_v21 = vmax.f32 %v608_v16, %v646_v2 }
 0x100   :  { %v609_v12 = vpop.f32.mrf.mxu0 }
 0x101   :  { %v647_v13 = vpop.f32.mrf.mxu1 }
 0x102   :  { %v610_v14 = vpop.f32.mrf.mxu0 }
 0x103   :  { %v648_v15 = vpop.f32.mrf.mxu1  ;;  %v611_v22 = vadd.f32 %v610_v14, %v609_v12 }
 0x104   :  { %v649_v23 = vadd.f32 %v648_v15, %v647_v13 }
 0x106   :  { %v234_v32 = vmax.f32 %v611_v22, %v649_v23 }
 0x108   :  { %v682_v17 = vpop.f32.mrf.mxu0 }
 0x109   :  { %v720_v18 = vpop.f32.mrf.mxu1 }
 0x10a   :  { %v683_v19 = vpop.f32.mrf.mxu0 }
 0x10b   :  { %v721_v20 = vpop.f32.mrf.mxu1  ;;  %v684_v24 = vadd.f32 %v683_v19, %v682_v17 }
 0x10c   :  { %v685_v25 = vpop.f32.mrf.mxu0  ;;  %v722_v28 = vadd.f32 %v721_v20, %v720_v18 }
 0x10d   :  { %v723_v26 = vpop.f32.mrf.mxu1  ;;  %v343_v27 = vmax.f32 %v233_v21, %v684_v24 }
 0x10e   :  { %v686_v30 = vpop.f32.mrf.mxu0 }
 0x10f   :  { %v724_v31 = vpop.f32.mrf.mxu1  ;;  %v453_v33 = vmax.f32 %v343_v27, %v722_v28  ;;  %v687_v34 = vadd.f32 %v686_v30, %v685_v25 }
 0x110   :  { %v725_v37 = vadd.f32 %v724_v31, %v723_v26 }
 0x111   :  { %v467_v35 = vadd.f32 %v460_v29, %v453_v33  ;;  %v344_v36 = vmax.f32 %v234_v32, %v687_v34 }
 0x113   :  { %v469_v38 = vmax.f32 %v467_v35, 0.0  ;;  %v454_v39 = vmax.f32 %v344_v36, %v725_v37 }
 0x115   :  { %472 = vst.msk [vmem:[%s1172_s3] sm:$0xff] %vm471_vm0, %v469_v38  ;;  %v468_v41 = vadd.f32 %v465_v40, %v454_v39 }
 0x117   :  { %v470_v42 = vmax.f32 %v468_v41, 0.0 }
 0x119   :  { %473 = vst.msk [vmem:[%s1172_s3 + $0x8] sm:$0xff] %vm471_vm0, %v470_v42 }

// kernel: lenet_forward.5
= control target key start
LH: loop header
LB: loop body
LE: loop exit
PB: predicated region body
PF: predicated region fallthrough
CT: control target
= control target key end

     0   :  { %v913_v27 = vmov 1983009808   ;;  %v140_v29 = vlaneseq  ;;  %s1416_s0 = inlined_call_operand.vmem [shape: f32[2,784], index: 0, kind: input, shape index: {}]   ;;  %s1417_s1 = inlined_call_operand.vmem [shape: f32[784,128], index: 1, kind: input, shape index: {}]   ;;  %s1418_s2 = inlined_call_operand.vmem [shape: f32[1,128], index: 2, kind: input, shape index: {}]   ;;  %s1419_s3 = inlined_call_operand.vmem [shape: f32[128,128], index: 3, kind: input, shape index: {}]   ;;  %s1420_s4 = inlined_call_operand.vmem [shape: f32[1,128], index: 4, kind: input, shape index: {}]   ;;  %s1421_s5 = inlined_call_operand.vmem [shape: f32[128,10], index: 5, kind: input, shape index: {}]   ;;  %s1422_s6 = inlined_call_operand.vmem [shape: f32[1,10], index: 6, kind: input, shape index: {}]   ;;  %s1423_s7 = inlined_call_operand.hbm [shape: f32[2,10], index: 7, kind: output, shape index: {}]  }
   0x1   :  { %v60_v0 = vld [vmem:[%s1417_s1 + $0xf8] sm:$0xff]  ;;  %v59_v2 = vld [vmem:[%s1417_s1 + $0xf0] sm:$0xff]  ;;  %v58_v6 = vld [vmem:[%s1417_s1 + $0xe8] sm:$0xff]  ;;  %v138_v28 = vunpack.c.l.s4 %v913_v27 }
   0x2   :  { %v44_v1 = vld [vmem:[%s1417_s1 + $0x78] sm:$0xff]  ;;  %666 = vmatprep.subr.mxu0 %v60_v0  ;;  %v43_v4 = vld [vmem:[%s1417_s1 + $0x70] sm:$0xff]  ;;  %v42_v8 = vld [vmem:[%s1417_s1 + $0x68] sm:$0xff]  ;;  %v141_v39 = vshrl.u32 %v140_v29, 7 }
   0x3   :  { %v92_v3 = vld [vmem:[%s1417_s1 + $0x1f8] sm:$0xff]  ;;  %667 = vmatpush3.msra.mxu0 %v44_v1  ;;  %v91_v7 = vld [vmem:[%s1417_s1 + $0x1f0] sm:$0xff]  ;;  %v90_v10 = vld [vmem:[%s1417_s1 + $0x1e8] sm:$0xff]  ;;  %v139_v38 = vunpack.c.0.s8 %v138_v28 }
   0x4   :  { %v76_v5 = vld [vmem:[%s1417_s1 + $0x178] sm:$0xff]  ;;  %701 = vmatprep.subr.mxu1 %v92_v3  ;;  %668 = vmatprep.subr.mxu0 %v59_v2  ;;  %v75_v9 = vld [vmem:[%s1417_s1 + $0x170] sm:$0xff]  ;;  %v57_v11 = vld [vmem:[%s1417_s1 + $0xe0] sm:$0xff] }
   0x5   :  { %702 = vmatpush3.msra.mxu1 %v76_v5  ;;  %669 = vmatpush3.msra.mxu0 %v43_v4  ;;  %v74_v12 = vld [vmem:[%s1417_s1 + $0x168] sm:$0xff]  ;;  %v41_v13 = vld [vmem:[%s1417_s1 + $0x60] sm:$0xff]  ;;  %v56_v15 = vld [vmem:[%s1417_s1 + $0xd8] sm:$0xff]  ;;  %v1086_v48 = vsub.s32 %v139_v38, %v141_v39 }
   0x6   :  { %703 = vmatprep.subr.mxu1 %v91_v7  ;;  %670 = vmatprep.subr.mxu0 %v58_v6  ;;  %v89_v14 = vld [vmem:[%s1417_s1 + $0x1e0] sm:$0xff]  ;;  %v40_v17 = vld [vmem:[%s1417_s1 + $0x58] sm:$0xff]  ;;  %v55_v19 = vld [vmem:[%s1417_s1 + $0xd0] sm:$0xff] }
   0x7   :  { %704 = vmatpush3.msra.mxu1 %v75_v9  ;;  %671 = vmatpush3.msra.mxu0 %v42_v8  ;;  %v73_v16 = vld [vmem:[%s1417_s1 + $0x160] sm:$0xff]  ;;  %v88_v18 = vld [vmem:[%s1417_s1 + $0x1d8] sm:$0xff]  ;;  %v39_v21 = vld [vmem:[%s1417_s1 + $0x50] sm:$0xff] }
   0x8   :  { %705 = vmatprep.subr.mxu1 %v90_v10  ;;  %672 = vmatprep.subr.mxu0 %v57_v11  ;;  %v72_v20 = vld [vmem:[%s1417_s1 + $0x158] sm:$0xff]  ;;  %v87_v22 = vld [vmem:[%s1417_s1 + $0x1d0] sm:$0xff]  ;;  %v54_v23 = vld [vmem:[%s1417_s1 + $0xc8] sm:$0xff] }
   0x9   :  { %706 = vmatpush3.msra.mxu1 %v74_v12  ;;  %673 = vmatpush3.msra.mxu0 %v41_v13  ;;  %v71_v24 = vld [vmem:[%s1417_s1 + $0x150] sm:$0xff]  ;;  %v38_v25 = vld [vmem:[%s1417_s1 + $0x48] sm:$0xff]  ;;  %v53_v30 = vld [vmem:[%s1417_s1 + $0xc0] sm:$0xff] }
   0xa   :  { %707 = vmatprep.subr.mxu1 %v89_v14  ;;  %674 = vmatprep.subr.mxu0 %v56_v15  ;;  %v86_v26 = vld [vmem:[%s1417_s1 + $0x1c8] sm:$0xff]  ;;  %v37_v32 = vld [vmem:[%s1417_s1 + $0x40] sm:$0xff]  ;;  %v52_v34 = vld [vmem:[%s1417_s1 + $0xb8] sm:$0xff] }
   0xb   :  { %708 = vmatpush3.msra.mxu1 %v73_v16  ;;  %675 = vmatpush3.msra.mxu0 %v40_v17  ;;  %v70_v31 = vld [vmem:[%s1417_s1 + $0x148] sm:$0xff]  ;;  %v85_v33 = vld [vmem:[%s1417_s1 + $0x1c0] sm:$0xff]  ;;  %v36_v36 = vld [vmem:[%s1417_s1 + $0x38] sm:$0xff] }
   0xc   :  { %709 = vmatprep.subr.mxu1 %v88_v18  ;;  %676 = vmatprep.subr.mxu0 %v55_v19  ;;  %v69_v35 = vld [vmem:[%s1417_s1 + $0x140] sm:$0xff]  ;;  %v84_v37 = vld [vmem:[%s1417_s1 + $0x1b8] sm:$0xff]  ;;  %v51_v40 = vld [vmem:[%s1417_s1 + $0xb0] sm:$0xff] }
   0xd   :  { %710 = vmatpush3.msra.mxu1 %v72_v20  ;;  %677 = vmatpush3.msra.mxu0 %v39_v21  ;;  %v68_v41 = vld [vmem:[%s1417_s1 + $0x138] sm:$0xff]  ;;  %v35_v42 = vld [vmem:[%s1417_s1 + $0x30] sm:$0xff]  ;;  %v50_v44 = vld [vmem:[%s1417_s1 + $0xa8] sm:$0xff] }
   0xe   :  { %711 = vmatprep.subr.mxu1 %v87_v22  ;;  %678 = vmatprep.subr.mxu0 %v54_v23  ;;  %v83_v43 = vld [vmem:[%s1417_s1 + $0x1b0] sm:$0xff]  ;;  %v34_v46 = vld [vmem:[%s1417_s1 + $0x28] sm:$0xff]  ;;  %v49_v49 = vld [vmem:[%s1417_s1 + $0xa0] sm:$0xff] }
   0xf   :  { %712 = vmatpush3.msra.mxu1 %v71_v24  ;;  %679 = vmatpush3.msra.mxu0 %v38_v25  ;;  %v67_v45 = vld [vmem:[%s1417_s1 + $0x130] sm:$0xff]  ;;  %v82_v47 = vld [vmem:[%s1417_s1 + $0x1a8] sm:$0xff]  ;;  %v27_v51 = vld [vmem:[%s1416_s0] sm:$0xff] }
  0x10   :  { %713 = vmatprep.subr.mxu1 %v86_v26  ;;  %680 = vmatprep.subr.mxu0 %v53_v30  ;;  %v66_v50 = vld [vmem:[%s1417_s1 + $0x128] sm:$0xff]  ;;  %v33_v52 = vld [vmem:[%s1417_s1 + $0x20] sm:$0xff]  ;;  %v48_v54 = vld [vmem:[%s1417_s1 + $0x98] sm:$0xff]  ;;  %v143_v58 = vrot.slane %v27_v51, %v1086_v48  ;;  %v136_v59 = vcombine.high %v27_v51, %v27_v51 }
  0x11   :  { %714 = vmatpush3.msra.mxu1 %v70_v31  ;;  %681 = vmatpush3.msra.mxu0 %v37_v32  ;;  %v81_v53 = vld [vmem:[%s1417_s1 + $0x1a0] sm:$0xff]  ;;  %v32_v56 = vld [vmem:[%s1417_s1 + $0x18] sm:$0xff]  ;;  %v47_v60 = vld [vmem:[%s1417_s1 + $0x90] sm:$0xff] }
  0x12   :  { %715 = vmatprep.subr.mxu1 %v85_v33  ;;  %682 = vmatprep.subr.mxu0 %v52_v34  ;;  %v65_v55 = vld [vmem:[%s1417_s1 + $0x120] sm:$0xff]  ;;  %v80_v57 = vld [vmem:[%s1417_s1 + $0x198] sm:$0xff]  ;;  %v31_v62 = vld [vmem:[%s1417_s1 + $0x10] sm:$0xff]  ;;  %v151_v4 = vcombine.high %v143_v58, %v143_v58  ;;  %v150_v5 = vrot.slane %v136_v59, %v1086_v48 }
  0x13   :  { %716 = vmatpush3.msra.mxu1 %v69_v35  ;;  %683 = vmatpush3.msra.mxu0 %v36_v36  ;;  %v64_v61 = vld [vmem:[%s1417_s1 + $0x118] sm:$0xff]  ;;  %v79_v63 = vld [vmem:[%s1417_s1 + $0x190] sm:$0xff]  ;;  %v46_v0 = vld [vmem:[%s1417_s1 + $0x88] sm:$0xff] }
  0x14   :  { %717 = vmatprep.subr.mxu1 %v84_v37  ;;  %684 = vmatprep.subr.mxu0 %v51_v40  ;;  %v63_v1 = vld [vmem:[%s1417_s1 + $0x110] sm:$0xff]  ;;  %v30_v2 = vld [vmem:[%s1417_s1 + $0x8] sm:$0xff]  ;;  %v45_v6 = vld [vmem:[%s1417_s1 + $0x80] sm:$0xff]  ;;  %v152_v12 = vcombine.high %v150_v5, %v150_v5 }
  0x15   :  { %718 = vmatpush3.msra.mxu1 %v68_v41  ;;  %685 = vmatpush3.msra.mxu0 %v35_v42  ;;  %v78_v3 = vld [vmem:[%s1417_s1 + $0x188] sm:$0xff]  ;;  %v29_v7 = vld [vmem:[%s1417_s1] sm:$0xff]  ;;  %v124_v10 = vld [vmem:[%s1417_s1 + $0x2f8] sm:$0xff] }
  0x16   :  { %719 = vmatprep.subr.mxu1 %v83_v43  ;;  %686 = vmatprep.subr.mxu0 %v50_v44  ;;  %v62_v8 = vld [vmem:[%s1417_s1 + $0x108] sm:$0xff]  ;;  %v77_v9 = vld [vmem:[%s1417_s1 + $0x180] sm:$0xff]  ;;  %v108_v13 = vld [vmem:[%s1417_s1 + $0x278] sm:$0xff] }
  0x17   :  { %720 = vmatpush3.msra.mxu1 %v67_v45  ;;  %687 = vmatpush3.msra.mxu0 %v34_v46  ;;  %v61_v11 = vld [vmem:[%s1417_s1 + $0x100] sm:$0xff]  ;;  %v28_v14 = vld [vmem:[%s1416_s0 + $0x8] sm:$0x3f]  ;;  %v123_v15 = vld [vmem:[%s1417_s1 + $0x2f0] sm:$0xff] }
  0x18   :  { %721 = vmatprep.subr.mxu1 %v82_v47  ;;  %688 = vmatprep.subr.mxu0 %v49_v49  ;;  %v1169_v16 = vrot.slane %v28_v14, %v1086_v48 }
  0x19   :  { %722 = vmatpush3.msra.mxu1 %v66_v50  ;;  %689 = vmatpush3.msra.mxu0 %v33_v52 }
  0x1a   :  { %723 = vmatprep.subr.mxu1 %v81_v53  ;;  %690 = vmatprep.subr.mxu0 %v48_v54 }
  0x1b   :  { %724 = vmatpush3.msra.mxu1 %v65_v55  ;;  %691 = vmatpush3.msra.mxu0 %v32_v56 }
  0x1c   :  { %725 = vmatprep.subr.mxu1 %v80_v57  ;;  %692 = vmatprep.subr.mxu0 %v47_v60 }
  0x1d   :  { %726 = vmatpush3.msra.mxu1 %v64_v61  ;;  %693 = vmatpush3.msra.mxu0 %v31_v62 }
  0x1e   :  { %727 = vmatprep.subr.mxu1 %v79_v63  ;;  %694 = vmatprep.subr.mxu0 %v46_v0 }
  0x1f   :  { %728 = vmatpush3.msra.mxu1 %v63_v1  ;;  %695 = vmatpush3.msra.mxu0 %v30_v2 }
  0x20   :  { %729 = vmatprep.subr.mxu1 %v78_v3  ;;  %696 = vmatprep.subr.mxu0 %v45_v6 }
  0x21   :  { %242 = vmatprep.mubr.f32.mxu0 %v151_v4  ;;  %697 = vmatpush3.msra.mxu0 %v29_v7 }
  0x22   :  { %730 = vmatpush3.msra.mxu1 %v62_v8  ;;  %243 = vmatmul.mubr.f32.vlgmr.msra.gmra.mxu0 %v143_v58 }
  0x23   :  { %731 = vmatprep.subr.mxu1 %v77_v9 }
  0x24   :  { %12 = vsyncpa [#allocation3], 0  ;;  %736 = vmatprep.subr.mxu0 %v124_v10  ;;  %732 = vmatpush3.msra.mxu1 %v61_v11  ;;  %v107_v17 = vld [vmem:[%s1417_s1 + $0x270] sm:$0xff]  ;;  %v122_v18 = vld [vmem:[%s1417_s1 + $0x2e8] sm:$0xff]  ;;  %v153_v19 = vcombine.high %v28_v14, %v28_v14  ;;  %v168_v20 = vcombine.high %v1169_v16, %v1169_v16  ;;  %v914_v25 = vmov 0.0   ;;  %vm175_vm0 = vcmask 130048  }
  0x25   :  { %312 = vmatprep.mubr.f32.mxu1 %v152_v12  ;;  %737 = vmatpush3.msra.mxu0 %v108_v13  ;;  %v106_v21 = vld [vmem:[%s1417_s1 + $0x268] sm:$0xff]  ;;  %v121_v23 = vld [vmem:[%s1417_s1 + $0x2e0] sm:$0xff]  ;;  %v120_v27 = vld [vmem:[%s1417_s1 + $0x2d8] sm:$0xff]  ;;  %vm915_vm1 = vmmov 0   ;;  %s916_s29 = smov [#allocation2]   ;;  %vm646_vm2 = vcmask 74752  }
  0x26   :  { %313 = vmatmul.mubr.f32.vlgmr.msra.gmra.mxu1 %v150_v5  ;;  %738 = vmatprep.subr.mxu0 %v123_v15  ;;  %v126_v22 = vld [vmem:[%s1417_s1 + $0x308] sm:$0xff]  ;;  %v105_v24 = vld [vmem:[%s1417_s1 + $0x260] sm:$0xff]  ;;  %v167_v28 = vrot.slane %v153_v19, %v1086_v48  ;;  %v104_v29 = vld [vmem:[%s1417_s1 + $0x258] sm:$0xff]  ;;  %s654_s30 = sshll.u32 %s916_s29, 4  ;;  %s655_s30 = int_to_ptr.vmem [resolvable:$true] %s654_s30 }
  0x27   :  { %739 = vmatpush3.msra.mxu0 %v107_v17  ;;  %382 = vmatprep.mubr.f32.mxu0 %v168_v20  ;;  %v125_v26 = vld [vmem:[%s1417_s1 + $0x300] sm:$0xff]  ;;  %v119_v30 = vld [vmem:[%s1417_s1 + $0x2d0] sm:$0xff]  ;;  %v118_v32 = vld [vmem:[%s1417_s1 + $0x2c8] sm:$0xff]  ;;  %p896_p1 = scmp.lt.s32.totalorder %s655_s30, %s655_s30 }
  0x28   :  { %740 = vmatprep.subr.mxu0 %v122_v18  ;;  %808 = vmatprep.subr.mxu1 %v914_v25  ;;  %v103_v31 = vld [vmem:[%s1417_s1 + $0x250] sm:$0xff]  ;;  %v102_v33 = vld [vmem:[%s1417_s1 + $0x248] sm:$0xff]  ;;  %v117_v34 = vld [vmem:[%s1417_s1 + $0x2c0] sm:$0xff] }
  0x29   :  { %741 = vmatpush3.msra.mxu0 %v106_v21  ;;  %809 = vmatpush3.msra.mxu1 %v126_v22  ;;  %v101_v35 = vld [vmem:[%s1417_s1 + $0x240] sm:$0xff]  ;;  %v116_v36 = vld [vmem:[%s1417_s1 + $0x2b8] sm:$0xff]  ;;  %v115_v38 = vld [vmem:[%s1417_s1 + $0x2b0] sm:$0xff] }
  0x2a   :  { %742 = vmatprep.subr.mxu0 %v121_v23  ;;  %810 = vmatprep.subr.mxu1 %v914_v25  ;;  %v100_v37 = vld [vmem:[%s1417_s1 + $0x238] sm:$0xff]  ;;  %v99_v39 = vld [vmem:[%s1417_s1 + $0x230] sm:$0xff]  ;;  %v114_v40 = vld [vmem:[%s1417_s1 + $0x2a8] sm:$0xff] }
  0x2b   :  { %743 = vmatpush3.msra.mxu0 %v105_v24  ;;  %811 = vmatpush3.msra.mxu1 %v125_v26  ;;  %v98_v41 = vld [vmem:[%s1417_s1 + $0x228] sm:$0xff]  ;;  %v113_v42 = vld [vmem:[%s1417_s1 + $0x2a0] sm:$0xff]  ;;  %v112_v44 = vld [vmem:[%s1417_s1 + $0x298] sm:$0xff] }
  0x2c   :  { %744 = vmatprep.subr.mxu0 %v120_v27  ;;  %812 = vmatprep.mubr.msk.f32.mxu1 %vm915_vm1, %v914_v25  ;;  %v97_v43 = vld [vmem:[%s1417_s1 + $0x220] sm:$0xff]  ;;  %v96_v45 = vld [vmem:[%s1417_s1 + $0x218] sm:$0xff]  ;;  %v111_v46 = vld [vmem:[%s1417_s1 + $0x290] sm:$0xff] }
  0x2d   :  { %745 = vmatpush3.msra.mxu0 %v104_v29  ;;  %813 = vmatmul.mubr.msk.f32.vlgmr.msra.gmra.mxu1 %vm175_vm0, %v167_v28  ;;  %v95_v47 = vld [vmem:[%s1417_s1 + $0x210] sm:$0xff]  ;;  %v110_v48 = vld [vmem:[%s1417_s1 + $0x288] sm:$0xff]  ;;  %v109_v50 = vld [vmem:[%s1417_s1 + $0x280] sm:$0xff] }
  0x2e   :  { %746 = vmatprep.subr.mxu0 %v119_v30  ;;  %815 = vmatprep.subr.mxu1 %v914_v25  ;;  %v94_v49 = vld [vmem:[%s1417_s1 + $0x208] sm:$0xff]  ;;  %v93_v51 = vld [vmem:[%s1417_s1 + $0x200] sm:$0xff]  ;;  %v474_v52 = vld [vmem:[%s1419_s3 + $0x78] sm:$0xff] }
  0x2f   :  { %747 = vmatpush3.msra.mxu0 %v103_v31  ;;  %847 = vmatprep.mubr.msk.f32.mxu1 %vm915_vm1, %v914_v25  ;;  %v473_v53 = vld [vmem:[%s1419_s3 + $0x70] sm:$0xff]  ;;  %v472_v54 = vld [vmem:[%s1419_s3 + $0x68] sm:$0xff]  ;;  %v471_v55 = vld [vmem:[%s1419_s3 + $0x60] sm:$0xff] }
  0x30   :  { %748 = vmatprep.subr.mxu0 %v118_v32  ;;  %816 = vmatpush3.msra.mxu1 %v474_v52  ;;  %v470_v56 = vld [vmem:[%s1419_s3 + $0x58] sm:$0xff]  ;;  %v469_v57 = vld [vmem:[%s1419_s3 + $0x50] sm:$0xff]  ;;  %v468_v58 = vld [vmem:[%s1419_s3 + $0x48] sm:$0xff] }
  0x31   :  { %749 = vmatpush3.msra.mxu0 %v102_v33  ;;  %817 = vmatprep.subr.mxu1 %v914_v25  ;;  %v467_v59 = vld [vmem:[%s1419_s3 + $0x40] sm:$0xff]  ;;  %v466_v60 = vld [vmem:[%s1419_s3 + $0x38] sm:$0xff]  ;;  %v465_v61 = vld [vmem:[%s1419_s3 + $0x30] sm:$0xff] }
  0x32   :  { %750 = vmatprep.subr.mxu0 %v117_v34  ;;  %818 = vmatpush3.msra.mxu1 %v473_v53  ;;  %v464_v62 = vld [vmem:[%s1419_s3 + $0x28] sm:$0xff]  ;;  %v463_v63 = vld [vmem:[%s1419_s3 + $0x20] sm:$0xff]  ;;  %v462_v0 = vld [vmem:[%s1419_s3 + $0x18] sm:$0xff] }
  0x33   :  { %751 = vmatpush3.msra.mxu0 %v101_v35  ;;  %819 = vmatprep.subr.mxu1 %v914_v25  ;;  %v461_v1 = vld [vmem:[%s1419_s3 + $0x10] sm:$0xff]  ;;  %v460_v2 = vld [vmem:[%s1419_s3 + $0x8] sm:$0xff]  ;;  %v459_v3 = vld [vmem:[%s1419_s3] sm:$0xff] }
  0x34   :  { %752 = vmatprep.subr.mxu0 %v116_v36  ;;  %820 = vmatpush3.msra.mxu1 %v472_v54  ;;  %v568_v4 = vld [vmem:[%s1421_s5 + $0x78] sm:$0xff]  ;;  %v567_v5 = vld [vmem:[%s1421_s5 + $0x70] sm:$0xff]  ;;  %v566_v6 = vld [vmem:[%s1421_s5 + $0x68] sm:$0xff] }
  0x35   :  { %753 = vmatpush3.msra.mxu0 %v100_v37  ;;  %821 = vmatprep.subr.mxu1 %v914_v25  ;;  %v565_v7 = vld [vmem:[%s1421_s5 + $0x60] sm:$0xff]  ;;  %v564_v8 = vld [vmem:[%s1421_s5 + $0x58] sm:$0xff]  ;;  %v563_v9 = vld [vmem:[%s1421_s5 + $0x50] sm:$0xff] }
  0x36   :  { %754 = vmatprep.subr.mxu0 %v115_v38  ;;  %822 = vmatpush3.msra.mxu1 %v471_v55  ;;  %v562_v10 = vld [vmem:[%s1421_s5 + $0x48] sm:$0xff]  ;;  %v561_v11 = vld [vmem:[%s1421_s5 + $0x40] sm:$0xff]  ;;  %v560_v12 = vld [vmem:[%s1421_s5 + $0x38] sm:$0xff] }
  0x37   :  { %755 = vmatpush3.msra.mxu0 %v99_v39  ;;  %823 = vmatprep.subr.mxu1 %v914_v25  ;;  %v559_v13 = vld [vmem:[%s1421_s5 + $0x30] sm:$0xff]  ;;  %v558_v14 = vld [vmem:[%s1421_s5 + $0x28] sm:$0xff]  ;;  %v557_v15 = vld [vmem:[%s1421_s5 + $0x20] sm:$0xff] }
  0x38   :  { %756 = vmatprep.subr.mxu0 %v114_v40  ;;  %824 = vmatpush3.msra.mxu1 %v470_v56  ;;  %v662_v24 = vld [vmem:[%s1418_s2] ss:$0 sm:$0xff]  ;;  %v555_v35 = vld [vmem:[%s1421_s5 + $0x10] sm:$0xff]  ;;  %v554_v36 = vld [vmem:[%s1421_s5 + $0x8] sm:$0xff] }
  0x39   :  { %757 = vmatpush3.msra.mxu0 %v98_v41  ;;  %825 = vmatprep.subr.mxu1 %v914_v25  ;;  %v553_v37 = vld [vmem:[%s1421_s5] sm:$0xff] }
  0x3a   :  { %758 = vmatprep.subr.mxu0 %v113_v42  ;;  %826 = vmatpush3.msra.mxu1 %v469_v57  ;;  %v664_v38 = vld [vmem:[%s1420_s4] ss:$0 sm:$0xff] }
  0x3b   :  { %759 = vmatpush3.msra.mxu0 %v97_v43  ;;  %827 = vmatprep.subr.mxu1 %v914_v25  ;;  %v665_v43 = vld [vmem:[%s1422_s6] ss:$0 sm:$0xff] }
  0x3c   :  { %760 = vmatprep.subr.mxu0 %v112_v44  ;;  %828 = vmatpush3.msra.mxu1 %v468_v58 }
  0x3d   :  { %761 = vmatpush3.msra.mxu0 %v96_v45  ;;  %829 = vmatprep.subr.mxu1 %v914_v25 }
  0x3e   :  { %762 = vmatprep.subr.mxu0 %v111_v46  ;;  %830 = vmatpush3.msra.mxu1 %v467_v59 }
  0x3f   :  { %763 = vmatpush3.msra.mxu0 %v95_v47  ;;  %831 = vmatprep.subr.mxu1 %v914_v25 }
  0x40   :  { %764 = vmatprep.subr.mxu0 %v110_v48  ;;  %832 = vmatpush3.msra.mxu1 %v466_v60 }
  0x41   :  { %765 = vmatpush3.msra.mxu0 %v94_v49  ;;  %833 = vmatprep.subr.mxu1 %v914_v25 }
  0x42   :  { %766 = vmatprep.subr.mxu0 %v109_v50  ;;  %834 = vmatpush3.msra.mxu1 %v465_v61 }
  0x43   :  { %767 = vmatpush3.msra.mxu0 %v93_v51  ;;  %835 = vmatprep.subr.mxu1 %v914_v25 }
  0x44   :  { %383 = vmatmul.mubr.f32.vlgmr.msra.gmra.mxu0 %v1169_v16  ;;  %850 = vmatprep.subr.mxu0 %v914_v25  ;;  %v556_v16 = vld [vmem:[%s1421_s5 + $0x18] sm:$0xff]  ;;  %s891_s5 = scalar_lea.vmem %s655_s30, 32 }
  0x45   :  { %882 = vmatprep.mubr.msk.f32.mxu0 %vm915_vm1, %v914_v25  ;;  %836 = vmatpush3.msra.mxu1 %v464_v62  ;;  %p892_p0 = scmp.ne.s32.totalorder %s655_s30, %s891_s5  ;;  %p897_p2 = scmp.lt.s32.totalorder %s891_s5, %s891_s5 }
  0x46   :  { %837 = vmatprep.subr.mxu1 %v914_v25  ;;  %851 = vmatpush3.msra.mxu0 %v568_v4 }
  0x47   :  { %838 = vmatpush3.msra.mxu1 %v463_v63  ;;  %852 = vmatprep.subr.mxu0 %v914_v25  ;;  %p898_p3 = por %p897_p2, %p896_p1 }
  0x48   :  { %839 = vmatprep.subr.mxu1 %v914_v25  ;;  %853 = vmatpush3.msra.mxu0 %v567_v5 }
  0x49   :  { %840 = vmatpush3.msra.mxu1 %v462_v0  ;;  %854 = vmatprep.subr.mxu0 %v914_v25  ;;  %p899_p4 = pnand %p898_p3, %p892_p0 }
  0x4a   :  { %841 = vmatprep.subr.mxu1 %v914_v25  ;;  %855 = vmatpush3.msra.mxu0 %v566_v6 }
  0x4b   :  { %842 = vmatpush3.msra.mxu1 %v461_v1  ;;  %856 = vmatprep.subr.mxu0 %v914_v25 }
  0x4c   :  { %843 = vmatprep.subr.mxu1 %v914_v25  ;;  %857 = vmatpush3.msra.mxu0 %v565_v7 }
  0x4d   :  { %844 = vmatpush3.msra.mxu1 %v460_v2  ;;  %858 = vmatprep.subr.mxu0 %v914_v25 }
  0x4e   :  { %845 = vmatprep.subr.mxu1 %v914_v25  ;;  %859 = vmatpush3.msra.mxu0 %v564_v8 }
  0x4f   :  { %846 = vmatpush3.msra.mxu1 %v459_v3  ;;  %860 = vmatprep.subr.mxu0 %v914_v25 }
  0x50   :  { %861 = vmatpush3.msra.mxu0 %v563_v9 }
  0x51   :  { %862 = vmatprep.subr.mxu0 %v914_v25 }
  0x52   :  { %863 = vmatpush3.msra.mxu0 %v562_v10 }
  0x53   :  { %864 = vmatprep.subr.mxu0 %v914_v25 }
  0x54   :  { %865 = vmatpush3.msra.mxu0 %v561_v11 }
  0x55   :  { %866 = vmatprep.subr.mxu0 %v914_v25 }
  0x56   :  { %867 = vmatpush3.msra.mxu0 %v560_v12 }
  0x57   :  { %868 = vmatprep.subr.mxu0 %v914_v25 }
  0x58   :  { %869 = vmatpush3.msra.mxu0 %v559_v13 }
  0x59   :  { %870 = vmatprep.subr.mxu0 %v914_v25 }
  0x5a   :  { %871 = vmatpush3.msra.mxu0 %v558_v14 }
  0x5b   :  { %872 = vmatprep.subr.mxu0 %v914_v25 }
  0x5c   :  { %873 = vmatpush3.msra.mxu0 %v557_v15 }
  0x5d   :  { %874 = vmatprep.subr.mxu0 %v914_v25 }
  0x5e   :  { %875 = vmatpush3.msra.mxu0 %v556_v16 }
  0x5f   :  { %876 = vmatprep.subr.mxu0 %v914_v25 }
  0x60   :  { %877 = vmatpush3.msra.mxu0 %v555_v35 }
  0x61   :  { %878 = vmatprep.subr.mxu0 %v914_v25 }
  0x62   :  { %879 = vmatpush3.msra.mxu0 %v554_v36 }
  0x63   :  { %880 = vmatprep.subr.mxu0 %v914_v25 }
  0x64   :  { %881 = vmatpush3.msra.mxu0 %v553_v37 }
  0xe2   :  { %v698_v21 = vpop.f32.mrf.mxu0 }
  0xe4   :  { %v699_v22 = vpop.f32.mrf.mxu0 }
  0xe5   :  { %v700_v23 = vadd.f32 %v699_v22, %v698_v21 }
  0xe6   :  { %v733_v17 = vpop.f32.mrf.mxu1 }
  0xe7   :  { %v245_v26 = vadd.f32 %v700_v23, %v662_v24 }
  0xe8   :  { %v734_v18 = vpop.f32.mrf.mxu1 }
  0xe9   :  { %v735_v27 = vadd.f32 %v734_v18, %v733_v17 }
  0xeb   :  { %v315_v30 = vadd.f32 %v735_v27, %v245_v26 }
  0xed   :  { %v454_v19 = vpop.f32.mrf.mxu1 }
  0xef   :  { %v814_v20 = vpop.f32.mrf.mxu1 }
 0x104   :  { %v768_v28 = vpop.f32.mrf.mxu0 }
 0x106   :  { %v769_v29 = vpop.f32.mrf.mxu0 }
 0x107   :  { %v770_v31 = vadd.f32 %v769_v29, %v768_v28 }
 0x109   :  { %v385_v32 = vadd.f32 %v770_v31, %v315_v30 }
 0x10b   :  { %v455_v33 = vadd.f32 %v454_v19, %v385_v32 }
 0x10d   :  { %v458_v34 = vmax.f32 %v455_v33, 0.0 }
 0x10f   :  { %848 = vmatmul.mubr.f32.vlgmr.msra.gmra.mxu1 %v458_v34 }
 0x1cf   :  { %v548_v39 = vpop.f32.mrf.mxu1 }
 0x1d0   :  { %v549_v40 = vadd.f32 %v664_v38, %v548_v39 }
 0x1d1   :  { %v849_v41 = vpop.f32.mrf.mxu1 }
 0x1d2   :  { %v552_v42 = vmax.f32 %v549_v40, 0.0 }
 0x1d4   :  { %883 = vmatmul.mubr.f32.vlgmr.msra.gmra.mxu0 %v552_v42 }
 0x294   :  { %v642_v25 = vpop.f32.mrf.mxu0 }
 0x295   :  { %v643_v44 = vadd.f32 %v665_v43, %v642_v25 }
 0x296   :  { %v884_v45 = vpop.f32.mrf.mxu0 }
 0x297   :  { %647 = vst.msk [vmem:[#allocation2] sm:$0x3] %vm646_vm2, %v643_v44 }
 0x298   :  { %902 = shalt.err (!%p899_p4)
}
 0x299   :  { %657 = dma.vmem_to_hbm [thread:$0]  %s655_s30, 32, %s1423_s7, [#allocation3]  }
 0x29a   :  { %911 = dma.done.wait [#allocation3], 32  }
 0x29b   :  { %912 = vsyncadd [#allocation3], 4294967264 }
 0x29c   :  { %661 = vsyncpa [#allocation3], 1 }

</bundles_post_ra>
